<compile_context>
chip_gen: v7x
topology: tpu7x:2x2x1
jax: 0.10.0
libtpu: 0.0.40
codegen_flags: <defaults>
</compile_context>

<pallas_src>
import functools

import jax
import jax.numpy as jnp
from jax import lax
from jax.experimental import pallas as pl
from jax.experimental.pallas import tpu as pltpu


# --------------------------------------------------------------------------
# Fused Pallas kernels
# --------------------------------------------------------------------------
def _bnrelu_conv3x3_shortcut_kernel(
    up_c_ref, up_t_ref, up_b_ref, sk_c_ref, sk_t_ref, sk_b_ref,
    sc1_ref, sh1_ref, w1_ref, b1_ref, ws_ref, bs_ref,
    x1_ref, s_ref, xsum_ref, xsq_ref, *, conv_dtype):
    """One (1, TH, W, *) row tile of one image.

    Fuses BN1+ReLU, the 3x3 conv (three per-kh MXU dots), the 1x1 shortcut conv
    on the raw concat, and the BN2 partial statistics.  `cat` lives only in VMEM.
    """
    h = pl.program_id(1)
    last = pl.num_programs(1) - 1

    TH, W = up_c_ref.shape[1], up_c_ref.shape[2]
    cout = x1_ref.shape[-1]

    # Channel concat in VMEM (torch.cat(dim=1) order: [upsampled, skip]).
    cat_c = jnp.concatenate(
        [up_c_ref[0].astype(jnp.float32), sk_c_ref[0].astype(jnp.float32)], axis=-1)
    cat_t = jnp.concatenate(
        [up_t_ref[0].astype(jnp.float32), sk_t_ref[0].astype(jnp.float32)], axis=-1)
    cat_b = jnp.concatenate(
        [up_b_ref[0].astype(jnp.float32), sk_b_ref[0].astype(jnp.float32)], axis=-1)
    ccat = cat_c.shape[-1]

    sc1 = sc1_ref[...]        # (1, ccat) f32
    sh1 = sh1_ref[...]

    # 1x1 shortcut conv on the raw tile (single MXU dot) -- fused so `cat` is
    # read from HBM exactly once.
    s2d = jnp.dot(cat_c.reshape(TH * W, ccat).astype(conv_dtype), ws_ref[...],
                  preferred_element_type=jnp.float32) + bs_ref[...]
    s_ref[...] = s2d.reshape(1, TH, W, cout).astype(s_ref.dtype)

    # BN1 + ReLU (f32 math).  The conv zero-padding lives in the POST-activation
    # domain, so the halo rows at the image top/bottom edges are zeroed AFTER
    # the activation (this was the previous correctness bug).
    act_c = jnp.maximum(cat_c * sc1 + sh1, 0.0)
    act_t = jnp.maximum(cat_t * sc1 + sh1, 0.0) * (h > 0).astype(jnp.float32)
    act_b = jnp.maximum(cat_b * sc1 + sh1, 0.0) * (h < last).astype(jnp.float32)

    # Cast BEFORE building the im2col staging buffers (halves copy bytes / VMEM
    # in bf16 mode).  W halo is zero-padded in VMEM (no HBM pad copy).
    rows = jnp.concatenate([act_t.astype(conv_dtype),
                            act_c.astype(conv_dtype),
                            act_b.astype(conv_dtype)], axis=0)      # (TH+2, W, C)
    zcol = jnp.zeros((TH + 2, 1, ccat), conv_dtype)
    ypad = jnp.concatenate([zcol, rows, zcol], axis=1)              # (TH+2, W+2, C)

    # 3x3 conv as THREE per-kh dots (K = 3*ccat each): the staged patch buffer
    # is 3x the activation tile (conv_dtype), not 9x in f32.  f32 accumulation.
    acc = b1_ref[...]                                               # (1, cout) f32
    for kh in range(3):
        g = ypad[kh:kh + TH]                                        # (TH, W+2, C)
        pk = jnp.concatenate([g[:, 0:W], g[:, 1:W + 1], g[:, 2:W + 2]],
                             axis=-1).reshape(TH * W, 3 * ccat)
        acc = acc + jnp.dot(pk, w1_ref[pl.ds(kh * 3 * ccat, 3 * ccat), :],
                            preferred_element_type=jnp.float32)

    x1_ref[...] = acc.reshape(1, TH, W, cout).astype(x1_ref.dtype)

    # Per-tile partial reductions (f32, from the un-quantized accumulator) so
    # BN2 statistics need no extra pass over x1.
    xsum_ref[...] = jnp.sum(acc, axis=0, keepdims=True).reshape(1, 1, 1, cout)
    xsq_ref[...] = jnp.sum(acc * acc, axis=0, keepdims=True).reshape(1, 1, 1, cout)


def _bnrelu_conv3x3_add_kernel(
    x_c_ref, x_t_ref, x_b_ref, s_ref, sc2_ref, sh2_ref, w2_ref, b2_ref,
    out_ref, *, conv_dtype):
    """BN2+ReLU -> 3x3 conv (three per-kh dots) -> + shortcut, in one HBM pass."""
    h = pl.program_id(1)
    last = pl.num_programs(1) - 1
    TH, W = x_c_ref.shape[1], x_c_ref.shape[2]
    c = x_c_ref.shape[-1]
    cout = out_ref.shape[-1]

    sc2 = sc2_ref[...]
    sh2 = sh2_ref[...]

    # BN2 + ReLU, then zero the halo rows at image edges (post-activation pad).
    act_c = jnp.maximum(x_c_ref[0].astype(jnp.float32) * sc2 + sh2, 0.0)
    act_t = (jnp.maximum(x_t_ref[0].astype(jnp.float32) * sc2 + sh2, 0.0)
             * (h > 0).astype(jnp.float32))
    act_b = (jnp.maximum(x_b_ref[0].astype(jnp.float32) * sc2 + sh2, 0.0)
             * (h < last).astype(jnp.float32))

    rows = jnp.concatenate([act_t.astype(conv_dtype),
                            act_c.astype(conv_dtype),
                            act_b.astype(conv_dtype)], axis=0)      # (TH+2, W, c)
    zcol = jnp.zeros((TH + 2, 1, c), conv_dtype)
    ypad = jnp.concatenate([zcol, rows, zcol], axis=1)              # (TH+2, W+2, c)

    acc = b2_ref[...]                                               # (1, cout) f32
    for kh in range(3):
        g = ypad[kh:kh + TH]
        pk = jnp.concatenate([g[:, 0:W], g[:, 1:W + 1], g[:, 2:W + 2]],
                             axis=-1).reshape(TH * W, 3 * c)
        acc = acc + jnp.dot(pk, w2_ref[pl.ds(kh * 3 * c, 3 * c), :],
                            preferred_element_type=jnp.float32)

    out = acc.reshape(TH, W, cout) + s_ref[0].astype(jnp.float32)   # fused residual
    out_ref[...] = out.reshape(1, TH, W, cout).astype(out_ref.dtype)


# --------------------------------------------------------------------------
# BlockSpec helpers
# --------------------------------------------------------------------------
def _row_halo_specs(TH, W, C, H):
    """Center row tile + 1-row top/bottom halo (clamped at the image edges).

    The halo specs have block size 1 along H, so the index_map returns the
    element row directly; edge rows are clamped and the kernel zeroes their
    activation.  Reads only TH+2 rows per tile, no HBM-side padding.
    """
    center = pl.BlockSpec((1, TH, W, C), lambda n, h: (n, h, 0, 0))
    top = pl.BlockSpec((1, 1, W, C),
                       lambda n, h: (n, jnp.maximum(h * TH - 1, 0), 0, 0))
    bot = pl.BlockSpec((1, 1, W, C),
                       lambda n, h: (n, jnp.minimum(h * TH + TH, H - 1), 0, 0))
    return center, top, bot


def _const_spec(shape):
    return pl.BlockSpec(shape, lambda n, h: (0,) * len(shape))


# --------------------------------------------------------------------------
# Generation-aware sizing (VMEM budget -> row_tile, vmem_limit_bytes)
# --------------------------------------------------------------------------
def _tpu_vmem_bytes():
    try:
        return int(pltpu.get_tpu_info().vmem_capacity_bytes)
    except Exception:
        return 64 << 20          # conservative default (v7x per-TC VMEM)


def _pick_row_tile(H, W, ccat, cout, conv_dtype, vmem_bytes):
    """Largest row tile (divisor of H, multiple of 8 or ==H) within VMEM budget."""
    cd = jnp.dtype(conv_dtype).itemsize
    sd = cd                                   # x1/s staged in conv_dtype
    budget = 0.5 * vmem_bytes                 # headroom for double-buffering slack
    for th in range(H, 0, -1):
        if H % th:
            continue
        if th % 8 and th != H:
            continue
        in_tiles = 2 * 4 * (th + 2) * W * ccat                       # f32 inputs, 2 bufs
        out_tiles = 2 * (th * W * 2 * cout * sd + 2 * cout * 4)      # x1+s (+stats), 2 bufs
        weights = (9 * ccat + ccat) * cout * cd * 2
        act = 2 * (th + 2) * (W + 2) * ccat * cd                     # rows + ypad
        patch = th * W * 3 * ccat * cd                               # one per-kh group
        accs = 2 * th * W * cout * 4
        if in_tiles + out_tiles + weights + act + patch + accs + (2 << 20) <= budget:
            return th
    return 8 if H % 8 == 0 else H


def _compiler_params(vmem_cap):
    limit = max(32 << 20, int(min(vmem_cap * 0.85, vmem_cap - (4 << 20))))
    return pltpu.CompilerParams(
        dimension_semantics=("parallel", "parallel"),
        vmem_limit_bytes=limit)


# --------------------------------------------------------------------------
# pallas_call wrappers
# --------------------------------------------------------------------------
def fused_bnrelu_conv1_shortcut(up, skip, scale1, shift1, w1, b1, ws, bs, *,
                                row_tile, conv_dtype, stage_dtype, vmem_cap):
    N, H, W, cu = up.shape
    cs = skip.shape[-1]
    ccat = cu + cs
    cout = w1.shape[-1]
    TH = row_tile
    assert H % TH == 0, (H, TH)
    HT = H // TH

    w1_2d = w1.reshape(9 * ccat, cout).astype(conv_dtype)
    ws_2d = ws.reshape(ccat, cout).astype(conv_dtype)
    b1_2d = b1.reshape(1, cout).astype(jnp.float32)
    bs_2d = bs.reshape(1, cout).astype(jnp.float32)
    sc1 = scale1.reshape(1, ccat).astype(jnp.float32)
    sh1 = shift1.reshape(1, ccat).astype(jnp.float32)

    up_c, up_t, up_b = _row_halo_specs(TH, W, cu, H)
    sk_c, sk_t, sk_b = _row_halo_specs(TH, W, cs, H)
    tile_out = pl.BlockSpec((1, TH, W, cout), lambda n, h: (n, h, 0, 0))
    stat_out = pl.BlockSpec((1, 1, 1, cout), lambda n, h: (n, h, 0, 0))

    return pl.pallas_call(
        functools.partial(_bnrelu_conv3x3_shortcut_kernel, conv_dtype=conv_dtype),
        grid=(N, HT),
        in_specs=[up_c, up_t, up_b, sk_c, sk_t, sk_b,
                  _const_spec((1, ccat)), _const_spec((1, ccat)),
                  _const_spec((9 * ccat, cout)), _const_spec((1, cout)),
                  _const_spec((ccat, cout)), _const_spec((1, cout))],
        out_specs=(tile_out, tile_out, stat_out, stat_out),
        out_shape=(jax.ShapeDtypeStruct((N, H, W, cout), stage_dtype),    # x1
                   jax.ShapeDtypeStruct((N, H, W, cout), stage_dtype),    # shortcut s
                   jax.ShapeDtypeStruct((N, HT, 1, cout), jnp.float32),   # sum(x1)
                   jax.ShapeDtypeStruct((N, HT, 1, cout), jnp.float32)),  # sum(x1^2)
        compiler_params=_compiler_params(vmem_cap),
    )(up, up, up, skip, skip, skip, sc1, sh1, w1_2d, b1_2d, ws_2d, bs_2d)


def fused_bnrelu_conv2_add(x1, s, scale2, shift2, w2, b2, *,
                           row_tile, conv_dtype, vmem_cap):
    N, H, W, c = x1.shape
    cout = w2.shape[-1]
    TH = row_tile
    assert H % TH == 0, (H, TH)
    HT = H // TH

    w2_2d = w2.reshape(9 * c, cout).astype(conv_dtype)
    b2_2d = b2.reshape(1, cout).astype(jnp.float32)
    sc2 = scale2.reshape(1, c).astype(jnp.float32)
    sh2 = shift2.reshape(1, c).astype(jnp.float32)

    x_c, x_t, x_b = _row_halo_specs(TH, W, c, H)
    tile_spec = pl.BlockSpec((1, TH, W, cout), lambda n, h: (n, h, 0, 0))

    return pl.pallas_call(
        functools.partial(_bnrelu_conv3x3_add_kernel, conv_dtype=conv_dtype),
        grid=(N, HT),
        in_specs=[x_c, x_t, x_b, tile_spec,
                  _const_spec((1, c)), _const_spec((1, c)),
                  _const_spec((9 * c, cout)), _const_spec((1, cout))],
        out_specs=tile_spec,
        out_shape=jax.ShapeDtypeStruct((N, H, W, cout), jnp.float32),
        compiler_params=_compiler_params(vmem_cap),
    )(x1, x1, x1, s, sc2, sh2, w2_2d, b2_2d)


# --------------------------------------------------------------------------
# Glue (plain JAX): bilinear upsample, BN statistics folding
# --------------------------------------------------------------------------
# TODO(synk): bilinear x2 upsample is a data-dependent gather+lerp; kept in plain JAX.
def upsample_bilinear_x2_align_corners(x):
    # x: (N, H, W, C) -> (N, 2H, 2W, C); nn.Upsample(scale_factor=2, 'bilinear',
    # align_corners=True)
    N, H, W, C = x.shape
    Ho, Wo = 2 * H, 2 * W

    def src_coords(In, On):
        if On == 1:
            return jnp.zeros((On,), jnp.float32)
        return jnp.arange(On, dtype=jnp.float32) * (In - 1) / (On - 1)

    ys = src_coords(H, Ho)
    xs = src_coords(W, Wo)
    y0 = jnp.clip(jnp.floor(ys).astype(jnp.int32), 0, H - 1)
    y1 = jnp.clip(y0 + 1, 0, H - 1)
    wy = (ys - y0.astype(jnp.float32))[None, :, None, None]
    x0 = jnp.clip(jnp.floor(xs).astype(jnp.int32), 0, W - 1)
    x1 = jnp.clip(x0 + 1, 0, W - 1)
    wx = (xs - x0.astype(jnp.float32))[None, None, :, None]

    top = x[:, y0][:, :, x0] * (1.0 - wx) + x[:, y0][:, :, x1] * wx
    bot = x[:, y1][:, :, x0] * (1.0 - wx) + x[:, y1][:, :, x1] * wx
    return top * (1.0 - wy) + bot * wy


def _bn_scale_shift(mean, var, gamma, beta, eps=1e-5):
    scale = gamma / jnp.sqrt(var + eps)
    return scale, beta - mean * scale


# --------------------------------------------------------------------------
# decoder_block forward (NCHW in / NCHW out, NHWC inside)
# --------------------------------------------------------------------------
def decoder_block_forward(inputs_nchw, skip_nchw, params, *, row_tile=None,
                          conv_dtype=jnp.bfloat16):
    conv_dtype = jnp.dtype(conv_dtype)
    stage_dtype = conv_dtype          # x1 / s staged in bf16 when conv runs bf16

    inputs = jnp.transpose(inputs_nchw, (0, 2, 3, 1))   # NHWC
    skip = jnp.transpose(skip_nchw, (0, 2, 3, 1))       # NHWC

    up = upsample_bilinear_x2_align_corners(inputs)
    N, H, W, cu = up.shape
    ccat = cu + skip.shape[-1]
    cout = params["w_c1"].shape[-1]

    vmem_cap = _tpu_vmem_bytes()
    if row_tile is None:
        row_tile = _pick_row_tile(H, W, ccat, cout, conv_dtype, vmem_cap)
    assert H % row_tile == 0, (H, row_tile)

    # Training-mode BN1 statistics of the (virtual) concat: per-channel over
    # (N, H, W), computable from `up` and `skip` separately, so the concatenated
    # tensor is never written to HBM.
    mean1 = jnp.concatenate([jnp.mean(up, (0, 1, 2)), jnp.mean(skip, (0, 1, 2))])
    var1 = jnp.concatenate([jnp.var(up, (0, 1, 2)), jnp.var(skip, (0, 1, 2))])
    scale1, shift1 = _bn_scale_shift(mean1, var1, params["g1"], params["be1"])

    x1, s, xsum, xsq = fused_bnrelu_conv1_shortcut(
        up, skip, scale1, shift1, params["w_c1"], params["b_c1"],
        params["w_s"], params["b_s"], row_tile=row_tile, conv_dtype=conv_dtype,
        stage_dtype=stage_dtype, vmem_cap=vmem_cap)

    # BN2 statistics from the per-tile f32 partial sums emitted by kernel 1
    # (no extra full HBM read of x1).  One-pass var; fine in f32 at these scales.
    count = N * H * W
    mean2 = jnp.sum(xsum, axis=(0, 1, 2)) / count
    var2 = jnp.sum(xsq, axis=(0, 1, 2)) / count - mean2 * mean2
    scale2, shift2 = _bn_scale_shift(mean2, var2, params["g2"], params["be2"])

    out = fused_bnrelu_conv2_add(
        x1, s, scale2, shift2, params["w_c2"], params["b_c2"],
        row_tile=row_tile, conv_dtype=conv_dtype, vmem_cap=vmem_cap)
    return jnp.transpose(out, (0, 3, 1, 2))             # back to NCHW


# --------------------------------------------------------------------------
# Pure-JAX reference for correctness
# --------------------------------------------------------------------------
def decoder_block_reference(inputs_nchw, skip_nchw, params):
    inputs = jnp.transpose(inputs_nchw, (0, 2, 3, 1))
    skip = jnp.transpose(skip_nchw, (0, 2, 3, 1))
    up = upsample_bilinear_x2_align_corners(inputs)
    cat = jnp.concatenate([up, skip], axis=-1)

    def bn_relu_ref(x, g, b):
        m = jnp.mean(x, axis=(0, 1, 2))
        v = jnp.var(x, axis=(0, 1, 2))
        return jnp.maximum((x - m) / jnp.sqrt(v + 1e-5) * g + b, 0.0)

    def conv_ref(x, w, bias, pad):
        y = lax.conv_general_dilated(
            x, w, window_strides=(1, 1), padding=[(pad, pad), (pad, pad)],
            dimension_numbers=("NHWC", "HWIO", "NHWC"),
            precision=lax.Precision.HIGHEST)
        return y + bias.reshape(1, 1, 1, -1)

    x = bn_relu_ref(cat, params["g1"], params["be1"])
    x = conv_ref(x, params["w_c1"], params["b_c1"], 1)
    x = bn_relu_ref(x, params["g2"], params["be2"])
    x = conv_ref(x, params["w_c2"], params["b_c2"], 1)
    s = conv_ref(cat, params["w_s"], params["b_s"], 0)
    return jnp.transpose(x + s, (0, 3, 1, 2))


# --------------------------------------------------------------------------
# Deterministic parameter init + demo
# --------------------------------------------------------------------------
def init_params(key, in_c, out_c):
    tot = in_c + out_c
    ks = jax.random.split(key, 8)
    return {
        "g1": 1.0 + 0.1 * jax.random.normal(ks[0], (tot,), jnp.float32),
        "be1": 0.1 * jax.random.normal(ks[1], (tot,), jnp.float32),
        "w_c1": 0.1 * jax.random.normal(ks[2], (3, 3, tot, out_c), jnp.float32),
        "b_c1": 0.1 * jax.random.normal(ks[3], (out_c,), jnp.float32),
        "g2": 1.0 + 0.1 * jax.random.normal(ks[4], (out_c,), jnp.float32),
        "be2": 0.1 * jax.random.normal(ks[5], (out_c,), jnp.float32),
        "w_c2": 0.1 * jax.random.normal(ks[6], (3, 3, out_c, out_c), jnp.float32),
        "b_c2": 0.1 * jax.random.normal(ks[7], (out_c,), jnp.float32),
        "w_s": 0.1 * jax.random.normal(jax.random.fold_in(key, 100),
                                       (1, 1, tot, out_c), jnp.float32),
        "b_s": 0.1 * jax.random.normal(jax.random.fold_in(key, 101),
                                       (out_c,), jnp.float32),
    }


if __name__ == "__main__":
    key = jax.random.PRNGKey(0)
    in_c, out_c = 4, 4
    N, H, W = 2, 8, 8  # decoder input; skip comes from the encoder at 2x spatial size

    k_in, k_skip, k_par = jax.random.split(key, 3)
    inputs = jax.random.normal(k_in, (N, in_c, H, W), jnp.float32)           # NCHW
    skip = jax.random.normal(k_skip, (N, out_c, 2 * H, 2 * W), jnp.float32)  # NCHW
    params = init_params(k_par, in_c, out_c)

    ref = jax.block_until_ready(decoder_block_reference(inputs, skip, params))

    # f32 debug path: tight check of the fused-kernel math.
    out_f32 = jax.block_until_ready(
        decoder_block_forward(inputs, skip, params, conv_dtype=jnp.float32))
    assert out_f32.shape == (N, out_c, 2 * H, 2 * W), out_f32.shape
    err_f32 = float(jnp.max(jnp.abs(out_f32 - ref)))
    assert err_f32 < 5e-3, err_f32

    # Default path: bf16 MXU operands + bf16 staging of x1/s (f32 accumulation).
    out_bf16 = jax.block_until_ready(decoder_block_forward(inputs, skip, params))
    err_bf16 = float(jnp.max(jnp.abs(out_bf16 - ref)))
    assert err_bf16 < 3e-1, err_bf16

    print("KERNEL_OK")
</pallas_src>

<mosaic_0001>
module attributes {stable_mosaic.version = 11 : i64} {
  func.func @_bnrelu_conv3x3_shortcut_kernel(%arg0: i32, %arg1: i32, %arg2: memref<1x16x16x4xf32, #tpu.memory_space<vmem>>, %arg3: memref<1x1x16x4xf32, #tpu.memory_space<vmem>>, %arg4: memref<1x1x16x4xf32, #tpu.memory_space<vmem>>, %arg5: memref<1x16x16x4xf32, #tpu.memory_space<vmem>>, %arg6: memref<1x1x16x4xf32, #tpu.memory_space<vmem>>, %arg7: memref<1x1x16x4xf32, #tpu.memory_space<vmem>>, %arg8: memref<1x8xf32, #tpu.memory_space<vmem>>, %arg9: memref<1x8xf32, #tpu.memory_space<vmem>>, %arg10: memref<72x4xf32, #tpu.memory_space<vmem>>, %arg11: memref<1x4xf32, #tpu.memory_space<vmem>>, %arg12: memref<8x4xf32, #tpu.memory_space<vmem>>, %arg13: memref<1x4xf32, #tpu.memory_space<vmem>>, %arg14: memref<1x16x16x4xf32, #tpu.memory_space<vmem>>, %arg15: memref<1x16x16x4xf32, #tpu.memory_space<vmem>>, %arg16: memref<1x1x1x4xf32, #tpu.memory_space<vmem>>, %arg17: memref<1x1x1x4xf32, #tpu.memory_space<vmem>>) attributes {dimension_semantics = [#tpu.dimension_semantics<parallel>, #tpu.dimension_semantics<parallel>], iteration_bounds = array<i64: 2, 1>, scalar_prefetch = 0 : i64, scratch_operands = 0 : i64, tpu.core_type = #tpu.core_type<tc>, window_params = [{transform_indices = @transform_0, window_bounds = array<i64: 1, 16, 16, 4>}, {transform_indices = @transform_1, window_bounds = array<i64: 1, 1, 16, 4>}, {transform_indices = @transform_2, window_bounds = array<i64: 1, 1, 16, 4>}, {transform_indices = @transform_3, window_bounds = array<i64: 1, 16, 16, 4>}, {transform_indices = @transform_4, window_bounds = array<i64: 1, 1, 16, 4>}, {transform_indices = @transform_5, window_bounds = array<i64: 1, 1, 16, 4>}, {pipeline_mode = #tpu.pipeline_mode<synchronous>, transform_indices = @transform_6, window_bounds = array<i64: 1, 8>}, {pipeline_mode = #tpu.pipeline_mode<synchronous>, transform_indices = @transform_7, window_bounds = array<i64: 1, 8>}, {pipeline_mode = #tpu.pipeline_mode<synchronous>, transform_indices = @transform_8, window_bounds = array<i64: 72, 4>}, {pipeline_mode = #tpu.pipeline_mode<synchronous>, transform_indices = @transform_9, window_bounds = array<i64: 1, 4>}, {pipeline_mode = #tpu.pipeline_mode<synchronous>, transform_indices = @transform_10, window_bounds = array<i64: 8, 4>}, {pipeline_mode = #tpu.pipeline_mode<synchronous>, transform_indices = @transform_11, window_bounds = array<i64: 1, 4>}, {transform_indices = @transform_12, window_bounds = array<i64: 1, 16, 16, 4>}, {transform_indices = @transform_13, window_bounds = array<i64: 1, 16, 16, 4>}, {transform_indices = @transform_14, window_bounds = array<i64: 1, 1, 1, 4>}, {transform_indices = @transform_15, window_bounds = array<i64: 1, 1, 1, 4>}]} {
    %c0 = arith.constant 0 : index
    %c0_0 = arith.constant 0 : index
    %c0_1 = arith.constant 0 : index
    %c0_2 = arith.constant 0 : index
    %0 = vector.load %arg2[%c0, %c0_0, %c0_1, %c0_2] : memref<1x16x16x4xf32, #tpu.memory_space<vmem>>, vector<1x16x16x4xf32>
    %1 = vector.shape_cast %0 : vector<1x16x16x4xf32> to vector<16x16x4xf32>
    %c0_3 = arith.constant 0 : index
    %c0_4 = arith.constant 0 : index
    %c0_5 = arith.constant 0 : index
    %c0_6 = arith.constant 0 : index
    %2 = vector.load %arg5[%c0_3, %c0_4, %c0_5, %c0_6] : memref<1x16x16x4xf32, #tpu.memory_space<vmem>>, vector<1x16x16x4xf32>
    %3 = vector.shape_cast %2 : vector<1x16x16x4xf32> to vector<16x16x4xf32>
    %4 = tpu.concatenate %1, %3 in 2 : vector<16x16x4xf32>, vector<16x16x4xf32> -> vector<16x16x8xf32>
    %c0_7 = arith.constant 0 : index
    %c0_8 = arith.constant 0 : index
    %c0_9 = arith.constant 0 : index
    %c0_10 = arith.constant 0 : index
    %5 = vector.load %arg3[%c0_7, %c0_8, %c0_9, %c0_10] : memref<1x1x16x4xf32, #tpu.memory_space<vmem>>, vector<1x1x16x4xf32>
    %6 = vector.shape_cast %5 : vector<1x1x16x4xf32> to vector<1x16x4xf32>
    %c0_11 = arith.constant 0 : index
    %c0_12 = arith.constant 0 : index
    %c0_13 = arith.constant 0 : index
    %c0_14 = arith.constant 0 : index
    %7 = vector.load %arg6[%c0_11, %c0_12, %c0_13, %c0_14] : memref<1x1x16x4xf32, #tpu.memory_space<vmem>>, vector<1x1x16x4xf32>
    %8 = vector.shape_cast %7 : vector<1x1x16x4xf32> to vector<1x16x4xf32>
    %9 = tpu.concatenate %6, %8 in 2 : vector<1x16x4xf32>, vector<1x16x4xf32> -> vector<1x16x8xf32>
    %c0_15 = arith.constant 0 : index
    %c0_16 = arith.constant 0 : index
    %c0_17 = arith.constant 0 : index
    %c0_18 = arith.constant 0 : index
    %10 = vector.load %arg4[%c0_15, %c0_16, %c0_17, %c0_18] : memref<1x1x16x4xf32, #tpu.memory_space<vmem>>, vector<1x1x16x4xf32>
    %11 = vector.shape_cast %10 : vector<1x1x16x4xf32> to vector<1x16x4xf32>
    %c0_19 = arith.constant 0 : index
    %c0_20 = arith.constant 0 : index
    %c0_21 = arith.constant 0 : index
    %c0_22 = arith.constant 0 : index
    %12 = vector.load %arg7[%c0_19, %c0_20, %c0_21, %c0_22] : memref<1x1x16x4xf32, #tpu.memory_space<vmem>>, vector<1x1x16x4xf32>
    %13 = vector.shape_cast %12 : vector<1x1x16x4xf32> to vector<1x16x4xf32>
    %14 = tpu.concatenate %11, %13 in 2 : vector<1x16x4xf32>, vector<1x16x4xf32> -> vector<1x16x8xf32>
    %c0_23 = arith.constant 0 : index
    %c0_24 = arith.constant 0 : index
    %15 = vector.load %arg8[%c0_23, %c0_24] : memref<1x8xf32, #tpu.memory_space<vmem>>, vector<1x8xf32>
    %c0_25 = arith.constant 0 : index
    %c0_26 = arith.constant 0 : index
    %16 = vector.load %arg9[%c0_25, %c0_26] : memref<1x8xf32, #tpu.memory_space<vmem>>, vector<1x8xf32>
    %17 = vector.shape_cast %4 : vector<16x16x8xf32> to vector<256x8xf32>
    %c0_27 = arith.constant 0 : index
    %c0_28 = arith.constant 0 : index
    %18 = vector.load %arg12[%c0_27, %c0_28] : memref<8x4xf32, #tpu.memory_space<vmem>>, vector<8x4xf32>
    %cst = arith.constant dense<0.000000e+00> : vector<256x4xf32>
    %19 = tpu.matmul %17, %18, %cst {dimension_numbers = #tpu.dot_dimension_numbers<[1], [0], [0], [1], [0, 0, 1, 1], [], []>} : vector<256x8xf32>, vector<8x4xf32>, vector<256x4xf32> -> vector<256x4xf32>
    %c0_29 = arith.constant 0 : index
    %c0_30 = arith.constant 0 : index
    %20 = vector.load %arg13[%c0_29, %c0_30] : memref<1x4xf32, #tpu.memory_space<vmem>>, vector<1x4xf32>
    %21 = vector.broadcast %20 : vector<1x4xf32> to vector<256x4xf32>
    %22 = arith.addf %19, %21 : vector<256x4xf32>
    %23 = vector.shape_cast %22 : vector<256x4xf32> to vector<1x16x16x4xf32>
    %c0_31 = arith.constant 0 : index
    %c0_32 = arith.constant 0 : index
    %c0_33 = arith.constant 0 : index
    %c0_34 = arith.constant 0 : index
    %24 = vector.load %arg15[%c0_31, %c0_32, %c0_33, %c0_34] : memref<1x16x16x4xf32, #tpu.memory_space<vmem>>, vector<1x16x16x4xf32>
    tpu.vector_store %arg15[%c0_31, %c0_32, %c0_33, %c0_34], %23 {strides = array<i32>} : memref<1x16x16x4xf32, #tpu.memory_space<vmem>>, vector<1x16x16x4xf32>,
    %25 = vector.shape_cast %15 : vector<1x8xf32> to vector<1x1x8xf32>
    %26 = vector.broadcast %25 : vector<1x1x8xf32> to vector<16x16x8xf32>
    %27 = arith.mulf %4, %26 : vector<16x16x8xf32>
    %28 = vector.shape_cast %16 : vector<1x8xf32> to vector<1x1x8xf32>
    %29 = vector.broadcast %28 : vector<1x1x8xf32> to vector<16x16x8xf32>
    %30 = arith.addf %27, %29 : vector<16x16x8xf32>
    %cst_35 = arith.constant 0.000000e+00 : f32
    %31 = vector.broadcast %cst_35 : f32 to vector<16x16x8xf32>
    %32 = arith.maximumf %30, %31 : vector<16x16x8xf32>
    %33 = vector.shape_cast %15 : vector<1x8xf32> to vector<1x1x8xf32>
    %34 = vector.broadcast %33 : vector<1x1x8xf32> to vector<1x16x8xf32>
    %35 = arith.mulf %9, %34 : vector<1x16x8xf32>
    %36 = vector.shape_cast %16 : vector<1x8xf32> to vector<1x1x8xf32>
    %37 = vector.broadcast %36 : vector<1x1x8xf32> to vector<1x16x8xf32>
    %38 = arith.addf %35, %37 : vector<1x16x8xf32>
    %cst_36 = arith.constant 0.000000e+00 : f32
    %39 = vector.broadcast %cst_36 : f32 to vector<1x16x8xf32>
    %40 = arith.maximumf %38, %39 : vector<1x16x8xf32>
    %c0_i32 = arith.constant 0 : i32
    %41 = arith.cmpi sgt, %arg1, %c0_i32 : i32
    %42 = arith.extui %41 : i1 to i32
    %43 = arith.sitofp %42 : i32 to f32
    %44 = vector.broadcast %43 : f32 to vector<1x16x8xf32>
    %45 = arith.mulf %40, %44 : vector<1x16x8xf32>
    %46 = vector.shape_cast %15 : vector<1x8xf32> to vector<1x1x8xf32>
    %47 = vector.broadcast %46 : vector<1x1x8xf32> to vector<1x16x8xf32>
    %48 = arith.mulf %14, %47 : vector<1x16x8xf32>
    %49 = vector.shape_cast %16 : vector<1x8xf32> to vector<1x1x8xf32>
    %50 = vector.broadcast %49 : vector<1x1x8xf32> to vector<1x16x8xf32>
    %51 = arith.addf %48, %50 : vector<1x16x8xf32>
    %cst_37 = arith.constant 0.000000e+00 : f32
    %52 = vector.broadcast %cst_37 : f32 to vector<1x16x8xf32>
    %53 = arith.maximumf %51, %52 : vector<1x16x8xf32>
    %c0_i32_38 = arith.constant 0 : i32
    %54 = arith.cmpi slt, %arg1, %c0_i32_38 : i32
    %55 = arith.extui %54 : i1 to i32
    %56 = arith.sitofp %55 : i32 to f32
    %57 = vector.broadcast %56 : f32 to vector<1x16x8xf32>
    %58 = arith.mulf %53, %57 : vector<1x16x8xf32>
    %59 = tpu.concatenate %45, %32, %58 in 0 : vector<1x16x8xf32>, vector<16x16x8xf32>, vector<1x16x8xf32> -> vector<18x16x8xf32>
    %cst_39 = arith.constant 0.000000e+00 : f32
    %60 = vector.broadcast %cst_39 : f32 to vector<18x1x8xf32>
    %61 = tpu.concatenate %60, %59, %60 in 1 : vector<18x1x8xf32>, vector<18x16x8xf32>, vector<18x1x8xf32> -> vector<18x18x8xf32>
    %c0_40 = arith.constant 0 : index
    %c0_41 = arith.constant 0 : index
    %62 = vector.load %arg11[%c0_40, %c0_41] : memref<1x4xf32, #tpu.memory_space<vmem>>, vector<1x4xf32>
    %63 = vector.extract_strided_slice %61 {offsets = [0, 0, 0], sizes = [16, 18, 8], strides = [1, 1, 1]} : vector<18x18x8xf32> to vector<16x18x8xf32>
    %64 = vector.extract_strided_slice %63 {offsets = [0, 0, 0], sizes = [16, 16, 8], strides = [1, 1, 1]} : vector<16x18x8xf32> to vector<16x16x8xf32>
    %65 = vector.extract_strided_slice %63 {offsets = [0, 1, 0], sizes = [16, 16, 8], strides = [1, 1, 1]} : vector<16x18x8xf32> to vector<16x16x8xf32>
    %66 = vector.extract_strided_slice %63 {offsets = [0, 2, 0], sizes = [16, 16, 8], strides = [1, 1, 1]} : vector<16x18x8xf32> to vector<16x16x8xf32>
    %67 = tpu.concatenate %64, %65, %66 in 2 : vector<16x16x8xf32>, vector<16x16x8xf32>, vector<16x16x8xf32> -> vector<16x16x24xf32>
    %68 = vector.shape_cast %67 : vector<16x16x24xf32> to vector<256x24xf32>
    %c0_42 = arith.constant 0 : index
    %c0_43 = arith.constant 0 : index
    %69 = vector.load %arg10[%c0_42, %c0_43] : memref<72x4xf32, #tpu.memory_space<vmem>>, vector<24x4xf32>
    %cst_44 = arith.constant dense<0.000000e+00> : vector<256x4xf32>
    %70 = tpu.matmul %68, %69, %cst_44 {dimension_numbers = #tpu.dot_dimension_numbers<[1], [0], [0], [1], [0, 0, 1, 1], [], []>} : vector<256x24xf32>, vector<24x4xf32>, vector<256x4xf32> -> vector<256x4xf32>
    %71 = vector.broadcast %62 : vector<1x4xf32> to vector<256x4xf32>
    %72 = arith.addf %71, %70 : vector<256x4xf32>
    %73 = vector.extract_strided_slice %61 {offsets = [1, 0, 0], sizes = [16, 18, 8], strides = [1, 1, 1]} : vector<18x18x8xf32> to vector<16x18x8xf32>
    %74 = vector.extract_strided_slice %73 {offsets = [0, 0, 0], sizes = [16, 16, 8], strides = [1, 1, 1]} : vector<16x18x8xf32> to vector<16x16x8xf32>
    %75 = vector.extract_strided_slice %73 {offsets = [0, 1, 0], sizes = [16, 16, 8], strides = [1, 1, 1]} : vector<16x18x8xf32> to vector<16x16x8xf32>
    %76 = vector.extract_strided_slice %73 {offsets = [0, 2, 0], sizes = [16, 16, 8], strides = [1, 1, 1]} : vector<16x18x8xf32> to vector<16x16x8xf32>
    %77 = tpu.concatenate %74, %75, %76 in 2 : vector<16x16x8xf32>, vector<16x16x8xf32>, vector<16x16x8xf32> -> vector<16x16x24xf32>
    %78 = vector.shape_cast %77 : vector<16x16x24xf32> to vector<256x24xf32>
    %c24 = arith.constant 24 : index
    %c0_45 = arith.constant 0 : index
    %79 = vector.load %arg10[%c24, %c0_45] : memref<72x4xf32, #tpu.memory_space<vmem>>, vector<24x4xf32>
    %cst_46 = arith.constant dense<0.000000e+00> : vector<256x4xf32>
    %80 = tpu.matmul %78, %79, %cst_46 {dimension_numbers = #tpu.dot_dimension_numbers<[1], [0], [0], [1], [0, 0, 1, 1], [], []>} : vector<256x24xf32>, vector<24x4xf32>, vector<256x4xf32> -> vector<256x4xf32>
    %81 = arith.addf %72, %80 : vector<256x4xf32>
    %82 = vector.extract_strided_slice %61 {offsets = [2, 0, 0], sizes = [16, 18, 8], strides = [1, 1, 1]} : vector<18x18x8xf32> to vector<16x18x8xf32>
    %83 = vector.extract_strided_slice %82 {offsets = [0, 0, 0], sizes = [16, 16, 8], strides = [1, 1, 1]} : vector<16x18x8xf32> to vector<16x16x8xf32>
    %84 = vector.extract_strided_slice %82 {offsets = [0, 1, 0], sizes = [16, 16, 8], strides = [1, 1, 1]} : vector<16x18x8xf32> to vector<16x16x8xf32>
    %85 = vector.extract_strided_slice %82 {offsets = [0, 2, 0], sizes = [16, 16, 8], strides = [1, 1, 1]} : vector<16x18x8xf32> to vector<16x16x8xf32>
    %86 = tpu.concatenate %83, %84, %85 in 2 : vector<16x16x8xf32>, vector<16x16x8xf32>, vector<16x16x8xf32> -> vector<16x16x24xf32>
    %87 = vector.shape_cast %86 : vector<16x16x24xf32> to vector<256x24xf32>
    %c48 = arith.constant 48 : index
    %c0_47 = arith.constant 0 : index
    %88 = vector.load %arg10[%c48, %c0_47] : memref<72x4xf32, #tpu.memory_space<vmem>>, vector<24x4xf32>
    %cst_48 = arith.constant dense<0.000000e+00> : vector<256x4xf32>
    %89 = tpu.matmul %87, %88, %cst_48 {dimension_numbers = #tpu.dot_dimension_numbers<[1], [0], [0], [1], [0, 0, 1, 1], [], []>} : vector<256x24xf32>, vector<24x4xf32>, vector<256x4xf32> -> vector<256x4xf32>
    %90 = arith.addf %81, %89 : vector<256x4xf32>
    %91 = vector.shape_cast %90 : vector<256x4xf32> to vector<1x16x16x4xf32>
    %c0_49 = arith.constant 0 : index
    %c0_50 = arith.constant 0 : index
    %c0_51 = arith.constant 0 : index
    %c0_52 = arith.constant 0 : index
    %92 = vector.load %arg14[%c0_49, %c0_50, %c0_51, %c0_52] : memref<1x16x16x4xf32, #tpu.memory_space<vmem>>, vector<1x16x16x4xf32>
    tpu.vector_store %arg14[%c0_49, %c0_50, %c0_51, %c0_52], %91 {strides = array<i32>} : memref<1x16x16x4xf32, #tpu.memory_space<vmem>>, vector<1x16x16x4xf32>,
    %cst_53 = arith.constant dense<0.000000e+00> : vector<4xf32>
    %93 = vector.multi_reduction <add>, %90, %cst_53 [0] : vector<256x4xf32> to vector<4xf32>
    %94 = vector.shape_cast %93 : vector<4xf32> to vector<1x4xf32>
    %95 = vector.shape_cast %94 : vector<1x4xf32> to vector<1x1x1x4xf32>
    %c0_54 = arith.constant 0 : index
    %c0_55 = arith.constant 0 : index
    %c0_56 = arith.constant 0 : index
    %c0_57 = arith.constant 0 : index
    %96 = vector.load %arg16[%c0_54, %c0_55, %c0_56, %c0_57] : memref<1x1x1x4xf32, #tpu.memory_space<vmem>>, vector<1x1x1x4xf32>
    tpu.vector_store %arg16[%c0_54, %c0_55, %c0_56, %c0_57], %95 {strides = array<i32>} : memref<1x1x1x4xf32, #tpu.memory_space<vmem>>, vector<1x1x1x4xf32>,
    %97 = arith.mulf %90, %90 : vector<256x4xf32>
    %cst_58 = arith.constant dense<0.000000e+00> : vector<4xf32>
    %98 = vector.multi_reduction <add>, %97, %cst_58 [0] : vector<256x4xf32> to vector<4xf32>
    %99 = vector.shape_cast %98 : vector<4xf32> to vector<1x4xf32>
    %100 = vector.shape_cast %99 : vector<1x4xf32> to vector<1x1x1x4xf32>
    %c0_59 = arith.constant 0 : index
    %c0_60 = arith.constant 0 : index
    %c0_61 = arith.constant 0 : index
    %c0_62 = arith.constant 0 : index
    %101 = vector.load %arg17[%c0_59, %c0_60, %c0_61, %c0_62] : memref<1x1x1x4xf32, #tpu.memory_space<vmem>>, vector<1x1x1x4xf32>
    tpu.vector_store %arg17[%c0_59, %c0_60, %c0_61, %c0_62], %100 {strides = array<i32>} : memref<1x1x1x4xf32, #tpu.memory_space<vmem>>, vector<1x1x1x4xf32>,
    return
  }
  func.func @transform_0(%arg0: i32, %arg1: i32) -> (i32, i32, i32, i32) {
    %c0_i32 = arith.constant 0 : i32
    %c0_i32_0 = arith.constant 0 : i32
    %c0_i32_1 = arith.constant 0 : i32
    return %arg0, %arg1, %c0_i32, %c0_i32_0 : i32, i32, i32, i32
  }
  func.func @transform_1(%arg0: i32, %arg1: i32) -> (i32, i32, i32, i32) {
    %c16_i32 = arith.constant 16 : i32
    %0 = arith.muli %arg1, %c16_i32 : i32
    %c1_i32 = arith.constant 1 : i32
    %1 = arith.subi %0, %c1_i32 : i32
    %c0_i32 = arith.constant 0 : i32
    %2 = arith.maxsi %1, %c0_i32 : i32
    %c0_i32_0 = arith.constant 0 : i32
    %c0_i32_1 = arith.constant 0 : i32
    %c0_i32_2 = arith.constant 0 : i32
    return %arg0, %2, %c0_i32_0, %c0_i32_1 : i32, i32, i32, i32
  }
  func.func @transform_2(%arg0: i32, %arg1: i32) -> (i32, i32, i32, i32) {
    %c16_i32 = arith.constant 16 : i32
    %0 = arith.muli %arg1, %c16_i32 : i32
    %c16_i32_0 = arith.constant 16 : i32
    %1 = arith.addi %0, %c16_i32_0 : i32
    %c15_i32 = arith.constant 15 : i32
    %2 = arith.minsi %1, %c15_i32 : i32
    %c0_i32 = arith.constant 0 : i32
    %c0_i32_1 = arith.constant 0 : i32
    %c0_i32_2 = arith.constant 0 : i32
    return %arg0, %2, %c0_i32, %c0_i32_1 : i32, i32, i32, i32
  }
  func.func @transform_3(%arg0: i32, %arg1: i32) -> (i32, i32, i32, i32) {
    %c0_i32 = arith.constant 0 : i32
    %c0_i32_0 = arith.constant 0 : i32
    %c0_i32_1 = arith.constant 0 : i32
    return %arg0, %arg1, %c0_i32, %c0_i32_0 : i32, i32, i32, i32
  }
  func.func @transform_4(%arg0: i32, %arg1: i32) -> (i32, i32, i32, i32) {
    %c16_i32 = arith.constant 16 : i32
    %0 = arith.muli %arg1, %c16_i32 : i32
    %c1_i32 = arith.constant 1 : i32
    %1 = arith.subi %0, %c1_i32 : i32
    %c0_i32 = arith.constant 0 : i32
    %2 = arith.maxsi %1, %c0_i32 : i32
    %c0_i32_0 = arith.constant 0 : i32
    %c0_i32_1 = arith.constant 0 : i32
    %c0_i32_2 = arith.constant 0 : i32
    return %arg0, %2, %c0_i32_0, %c0_i32_1 : i32, i32, i32, i32
  }
  func.func @transform_5(%arg0: i32, %arg1: i32) -> (i32, i32, i32, i32) {
    %c16_i32 = arith.constant 16 : i32
    %0 = arith.muli %arg1, %c16_i32 : i32
    %c16_i32_0 = arith.constant 16 : i32
    %1 = arith.addi %0, %c16_i32_0 : i32
    %c15_i32 = arith.constant 15 : i32
    %2 = arith.minsi %1, %c15_i32 : i32
    %c0_i32 = arith.constant 0 : i32
    %c0_i32_1 = arith.constant 0 : i32
    %c0_i32_2 = arith.constant 0 : i32
    return %arg0, %2, %c0_i32, %c0_i32_1 : i32, i32, i32, i32
  }
  func.func @transform_6(%arg0: i32, %arg1: i32) -> (i32, i32) {
    %c0_i32 = arith.constant 0 : i32
    %c0_i32_0 = arith.constant 0 : i32
    %c0_i32_1 = arith.constant 0 : i32
    return %c0_i32, %c0_i32_0 : i32, i32
  }
  func.func @transform_7(%arg0: i32, %arg1: i32) -> (i32, i32) {
    %c0_i32 = arith.constant 0 : i32
    %c0_i32_0 = arith.constant 0 : i32
    %c0_i32_1 = arith.constant 0 : i32
    return %c0_i32, %c0_i32_0 : i32, i32
  }
  func.func @transform_8(%arg0: i32, %arg1: i32) -> (i32, i32) {
    %c0_i32 = arith.constant 0 : i32
    %c0_i32_0 = arith.constant 0 : i32
    %c0_i32_1 = arith.constant 0 : i32
    return %c0_i32, %c0_i32_0 : i32, i32
  }
  func.func @transform_9(%arg0: i32, %arg1: i32) -> (i32, i32) {
    %c0_i32 = arith.constant 0 : i32
    %c0_i32_0 = arith.constant 0 : i32
    %c0_i32_1 = arith.constant 0 : i32
    return %c0_i32, %c0_i32_0 : i32, i32
  }
  func.func @transform_10(%arg0: i32, %arg1: i32) -> (i32, i32) {
    %c0_i32 = arith.constant 0 : i32
    %c0_i32_0 = arith.constant 0 : i32
    %c0_i32_1 = arith.constant 0 : i32
    return %c0_i32, %c0_i32_0 : i32, i32
  }
  func.func @transform_11(%arg0: i32, %arg1: i32) -> (i32, i32) {
    %c0_i32 = arith.constant 0 : i32
    %c0_i32_0 = arith.constant 0 : i32
    %c0_i32_1 = arith.constant 0 : i32
    return %c0_i32, %c0_i32_0 : i32, i32
  }
  func.func @transform_12(%arg0: i32, %arg1: i32) -> (i32, i32, i32, i32) {
    %c0_i32 = arith.constant 0 : i32
    %c0_i32_0 = arith.constant 0 : i32
    %c0_i32_1 = arith.constant 0 : i32
    return %arg0, %arg1, %c0_i32, %c0_i32_0 : i32, i32, i32, i32
  }
  func.func @transform_13(%arg0: i32, %arg1: i32) -> (i32, i32, i32, i32) {
    %c0_i32 = arith.constant 0 : i32
    %c0_i32_0 = arith.constant 0 : i32
    %c0_i32_1 = arith.constant 0 : i32
    return %arg0, %arg1, %c0_i32, %c0_i32_0 : i32, i32, i32, i32
  }
  func.func @transform_14(%arg0: i32, %arg1: i32) -> (i32, i32, i32, i32) {
    %c0_i32 = arith.constant 0 : i32
    %c0_i32_0 = arith.constant 0 : i32
    %c0_i32_1 = arith.constant 0 : i32
    return %arg0, %arg1, %c0_i32, %c0_i32_0 : i32, i32, i32, i32
  }
  func.func @transform_15(%arg0: i32, %arg1: i32) -> (i32, i32, i32, i32) {
    %c0_i32 = arith.constant 0 : i32
    %c0_i32_0 = arith.constant 0 : i32
    %c0_i32_1 = arith.constant 0 : i32
    return %arg0, %arg1, %c0_i32, %c0_i32_0 : i32, i32, i32, i32
  }
}

</mosaic_0001>

<bundles_post_ra>
// kernel: tpu_custom_call.1
= control target key start
LH: loop header
LB: loop body
LE: loop exit
PB: predicated region body
PF: predicated region fallthrough
CT: control target
= control target key end

     0   :  { %s6144_s0 = inlined_call_operand.vmem [shape: f32[2,16,16,4], index: 0, kind: input, shape index: {}]   ;;  %s6145_s1 = inlined_call_operand.vmem [shape: f32[2,16,16,4], index: 1, kind: input, shape index: {}]   ;;  %s6146_s2 = inlined_call_operand.vmem [shape: f32[2,16,16,4], index: 2, kind: input, shape index: {}]   ;;  %s6147_s3 = inlined_call_operand.vmem [shape: f32[2,16,16,4], index: 3, kind: input, shape index: {}]   ;;  %s6148_s4 = inlined_call_operand.vmem [shape: f32[2,16,16,4], index: 4, kind: input, shape index: {}]   ;;  %s6149_s5 = inlined_call_operand.vmem [shape: f32[2,16,16,4], index: 5, kind: input, shape index: {}]   ;;  %s6150_s6 = inlined_call_operand.vmem [shape: f32[1,8], index: 6, kind: input, shape index: {}]   ;;  %s6151_s7 = inlined_call_operand.vmem [shape: f32[1,8], index: 7, kind: input, shape index: {}]   ;;  %s6152_s8 = inlined_call_operand.vmem [shape: f32[72,4], index: 8, kind: input, shape index: {}]   ;;  %s6153_s9 = inlined_call_operand.vmem [shape: f32[1,4], index: 9, kind: input, shape index: {}]   ;;  %s6154_s10 = inlined_call_operand.vmem [shape: f32[8,4], index: 10, kind: input, shape index: {}]   ;;  %s6155_s11 = inlined_call_operand.vmem [shape: f32[1,4], index: 11, kind: input, shape index: {}]   ;;  %s6156_s12 = inlined_call_operand.vmem [shape: f32[2,16,16,4], index: 12, kind: output, shape index: {0}]   ;;  %s6157_s13 = inlined_call_operand.vmem [shape: f32[2,16,16,4], index: 13, kind: output, shape index: {1}]   ;;  %s6158_s14 = inlined_call_operand.hbm [shape: f32[2,1,1,4], index: 14, kind: output, shape index: {2}]   ;;  %s6159_s15 = inlined_call_operand.hbm [shape: f32[2,1,1,4], index: 15, kind: output, shape index: {3}]  }
   0x1   :  { %6170 = sst [smem:[#allocation10_spill]] %s6144_s0 }
   0x2   :  { %6171 = sst [smem:[#allocation11_spill]] %s6145_s1 }
   0x3   :  { %6172 = sst [smem:[#allocation12_spill]] %s6146_s2 }
   0x4   :  { %6173 = sst [smem:[#allocation13_spill]] %s6147_s3 }
   0x5   :  { %6174 = sst [smem:[#allocation14_spill]] %s6148_s4 }
   0x6   :  { %6175 = sst [smem:[#allocation15_spill]] %s6154_s10 }
   0x7   :  { %21 = vsyncpa [#allocation3], 0 }
   0x8   :  { %23 = vsyncpa [#allocation3 + $0x1], 0 }
   0x9   :  { %24 = vsyncpa [#allocation5], 0 }
   0xa   :  { %26 = vsyncpa [#allocation5 + $0x1], 0  ;;  %s4652_s18 = smov 0   ;;  %s4654_s19 = smov 0  }
   0xb   :  { %s4656_s20 = smov 0   ;;  %s4658_s21 = smov 0  }
   0xc   :  { %s4660_s22 = smov 0   ;;  %s4662_s23 = smov 0  }
   0xd LB: > { %6176 = sst [smem:[#allocation8_spill]] %s4561_s22  ;;  %s3763_s24 = sadd.s32 4294967295, %s4565_s23   ;;  %s4565_s23 = sphi %s4662_s23, %s32_s23   ;;  %s4561_s22 = sphi %s4660_s22, %s6192_s22   ;;  %s4557_s21 = sphi %s4658_s21, %s6191_s21   ;;  %s4553_s20 = sphi %s4656_s20, %s6195_s20   ;;  %s4549_s19 = sphi %s4654_s19, %s6194_s19   ;;  %s4545_s18 = sphi %s4652_s18, %s6193_s18  }
   0xe   : > { %s3764_s25 = sadd.s32 4294967294, %s4565_s23   ;;  %s44_s26 = sadd.s32 1, %s4561_s22 }
   0xf   : > { %s435_s27 = sadd.s32 1, %s4553_s20  ;;  %p46_p0 = scmp.ge.s32.totalorder %s44_s26, 2 }
  0x10   : > { %p445_p1 = scmp.ne.s32.totalorder %s4553_s20, %s4549_s19  ;;  %p446_p2 = scmp.eq.s32.totalorder %s3763_s24, 1 }
  0x11   : > { %p451_p3 = scmp.ne.s32.totalorder %s4549_s19, %s4545_s18  ;;  %s6197_s26 = smov (%p46_p0, %s44_s26), 0 }
  0x12   : > { %6177 = sst [smem:[#allocation9_spill]] %s6197_s26  ;;  %p4692_p4 = por %p446_p2, %p445_p1 }
  0x13   : > { %p452_p5 = scmp.eq.s32.totalorder %s3764_s25, 1  ;;  %s430_s29 = ssub.s32 %s4561_s22, %s6197_s26 }
  0x14   : > { %p3767_p6 = scmp.ge.s32.totalorder %s4565_s23, 1  ;;  %p433_p7 = scmp.eq.s32.totalorder %s430_s29, 0 }
  0x15   : > { %p4699_p8 = por %p452_p5, %p451_p3  ;;  %p624_p9 = scmp.lt.s32.totalorder %s4565_s23, 3 }
  0x16   : > { %s4705_s16 = scalar_select %p433_p7, %s4553_s20, %s435_s27  }
  0x17   : > { %p625_p10 = pnand %p3767_p6, %p624_p9 }
  0x18   : > { %p763_p11 = scmp.lt.s32.totalorder (!%p625_p10), %s4557_s21, 1  ;;  %s6180_s10 = sld [smem:[#allocation15_spill]] (!%p625_p10)  ;;  %vm1066_vm0 = vcmask (!%p625_p10), 31744   ;;  %v4801_v37 = vld [vmem:[%s6150_s6] ss:$0 sm:$0xff] (!%p625_p10)  ;;  %vm1137_vm1 = vcmask (!%p625_p10), 64512  }
  0x19   : > { %628 = sbr.rel (%p625_p10) target bundleno = 793 (0x319), region = 68  ;;  %s6181_s3 = sld [smem:[#allocation13_spill]] (!%p625_p10)  ;;  %v4807_v41 = vld [vmem:[%s6151_s7] ss:$0 sm:$0xff] (!%p625_p10)  ;;  %v2647_v47 = vld [vmem:[%s6152_s8 + $0x18] sm:$0xff] (!%p625_p10)  ;;  %vm1659_vm2 = vcmask (!%p625_p10), 1040384  }
  0x1a   : > { %s6167_s17 = smov (!%p625_p10), 4   ;;  %s6182_s4 = sld [smem:[#allocation14_spill]] (!%p625_p10)  ;;  %v2648_v48 = vld [vmem:[%s6152_s8 + $0x20] sm:$0xff] (!%p625_p10)  ;;  %vm1837_vm3 = vcmask (!%p625_p10), 1046528   ;;  %vm2014_vm4 = vcmask (!%p625_p10), 1045504   ;;  %vm2223_vm5 = vcmask (!%p625_p10), 130048  }
  0x1b   : > { %s6183_s0 = sld [smem:[#allocation10_spill]] (!%p625_p10)  ;;  %v4286_v53 = vpack.c.bf16 (!%p625_p10), %v2648_v48, %v2647_v47  ;;  %s6184_s1 = sld [smem:[#allocation11_spill]] (!%p625_p10)  ;;  %vm2259_vm6 = vcmask (!%p625_p10), 195584   ;;  %vm3308_vm7 = vcmask (!%p625_p10), 24576  }
  0x1c   : > { %s6189_s2 = sld [smem:[#allocation12_spill]] (!%p625_p10) }
  0x1d   : > { %4287 = vmatprep.subr.bf16.mxu1 (!%p625_p10), %v4286_v53 }
  0x1e   : > { %v1129_v0 = vld [vmem:[%s6180_s10] sm:$0xff] (!%p625_p10)  ;;  %4289 = vmatpush3.bf16.msra.mxu1 (!%p625_p10), %v4286_v53 }
  0x1f   : > { %4070 = vmatprep.subr.mxu0 (!%p625_p10), %v1129_v0 }
  0x20   : > { %s764_s25 = scalar_select %p763_p11, %s4557_s21, 1  ;;  %4071 = vmatpush3.msra.mxu0 %v1129_v0 }
  0x22   : > { %s4712_s29 = sshll.u32 %s764_s25, 8  ;;  %s6163_s25 = smov 16  }
  0x23   : > { %s4718_s27 = scalar_lea.vmem %s6181_s3, %s4712_s29  ;;  %s830_s24 = scalar_lea.vmem %s6182_s4, %s4712_s29 }
  0x24   : > { %v906_v1 = vld [vmem:[%s4718_s27] sm:$0xff]  ;;  %v908_v2 = vld [vmem:[%s4718_s27 + $0x10] sm:$0xff]  ;;  %v907_v3 = vld [vmem:[%s4718_s27 + $0x8] sm:$0xff]  ;;  %s4794_s10 = scalar_lea.vmem %s6183_s0, %s4712_s29  ;;  %s785_s22 = scalar_lea.vmem %s6184_s1, %s4712_s29 }
  0x25   : > { %970 = vrot.lane.b32.xlu0 %v906_v1, %s6167_s17  ;;  %974 = vrot.lane.b32.xlu1 %v908_v2, %s6167_s17  ;;  %v909_v4 = vld [vmem:[%s4718_s27 + $0x18] sm:$0xff]  ;;  %v910_v5 = vld [vmem:[%s4718_s27 + $0x20] sm:$0xff]  ;;  %s6162_s3 = sadd.s32 240, %s4712_s29  ;;  %s5541_s26 = scalar_lea.vmem %s6157_s13, %s4712_s29 }
  0x26   : > { %v911_v6 = vld [vmem:[%s4718_s27 + $0x28] sm:$0xff]  ;;  %v912_v7 = vld [vmem:[%s4718_s27 + $0x30] sm:$0xff]  ;;  %v913_v8 = vld [vmem:[%s4718_s27 + $0x38] sm:$0xff] }
  0x27   : > { %v914_v9 = vld [vmem:[%s4718_s27 + $0x40] sm:$0xff]  ;;  %v915_v10 = vld [vmem:[%s4718_s27 + $0x48] sm:$0xff]  ;;  %v916_v11 = vld [vmem:[%s4718_s27 + $0x50] sm:$0xff] }
  0x28   : > { %v917_v12 = vld [vmem:[%s4718_s27 + $0x58] sm:$0xff]  ;;  %v918_v13 = vld [vmem:[%s4718_s27 + $0x60] sm:$0xff]  ;;  %v919_v14 = vld [vmem:[%s4718_s27 + $0x68] sm:$0xff] }
  0x29   : > { %972 = vrot.lane.b32.xlu0 %v907_v3, %s6167_s17  ;;  %976 = vrot.lane.b32.xlu1 %v909_v4, %s6167_s17  ;;  %v920_v15 = vld [vmem:[%s4718_s27 + $0x70] sm:$0xff]  ;;  %v921_v16 = vld [vmem:[%s4718_s27 + $0x78] sm:$0xff] }
  0x2a   : > { %v922_v17 = vld [vmem:[%s4718_s27 + $0x80] sm:$0xff]  ;;  %v923_v18 = vld [vmem:[%s4718_s27 + $0x88] sm:$0xff]  ;;  %v924_v19 = vld [vmem:[%s4718_s27 + $0x90] sm:$0xff] }
  0x2b   : > { %v925_v20 = vld [vmem:[%s4718_s27 + $0x98] sm:$0xff]  ;;  %v926_v21 = vld [vmem:[%s4718_s27 + $0xa0] sm:$0xff]  ;;  %v927_v22 = vld [vmem:[%s4718_s27 + $0xa8] sm:$0xff] }
  0x2c   : > { %v928_v23 = vld [vmem:[%s4718_s27 + $0xb0] sm:$0xff]  ;;  %v929_v24 = vld [vmem:[%s4718_s27 + $0xb8] sm:$0xff]  ;;  %v930_v25 = vld [vmem:[%s4718_s27 + $0xc0] sm:$0xff] }
  0x2d   : > { %978 = vrot.lane.b32.xlu0 %v910_v5, %s6167_s17  ;;  %980 = vrot.lane.b32.xlu1 %v911_v6, %s6167_s17  ;;  %v931_v26 = vld [vmem:[%s4718_s27 + $0xc8] sm:$0xff]  ;;  %v933_v27 = vld [vmem:[%s4718_s27 + $0xd8] sm:$0xff] }
  0x2e   : > { %v932_v28 = vld [vmem:[%s4718_s27 + $0xd0] sm:$0xff]  ;;  %v934_v29 = vld [vmem:[%s4718_s27 + $0xe0] sm:$0xff]  ;;  %v935_v30 = vld [vmem:[%s4718_s27 + $0xe8] sm:$0xff] }
  0x2f   : > { %v936_v31 = vld [vmem:[%s4718_s27 + $0xf0] sm:$0xff]  ;;  %v937_v32 = vld [vmem:[%s4718_s27 + $0xf8] sm:$0xff]  ;;  %v1102_v33 = vld [vmem:[%s830_s24 + $0x8] sm:$0xff]  ;;  %s847_s27 = scalar_lea.vmem %s6149_s5, %s6162_s3  ;;  %s5891_s3 = scalar_lea.vmem %s6156_s12, %s4712_s29 }
  0x30   : > { %v1101_v34 = vld [vmem:[%s830_s24] sm:$0xff]  ;;  %v876_v36 = vld [vmem:[%s4794_s10 + $0x10] sm:$0xff]  ;;  %v875_v45 = vld [vmem:[%s4794_s10 + $0x8] sm:$0xff]  ;;  %s6165_s24 = smov 8  }
  0x31   : > { %982 = vrot.lane.b32.xlu0 %v912_v7, %s6167_s17  ;;  %984 = vrot.lane.b32.xlu1 %v913_v8, %s6167_s17  ;;  %v874_v35 = vld [vmem:[%s4794_s10] sm:$0xff]  ;;  %v877_v46 = vld [vmem:[%s4794_s10 + $0x18] sm:$0xff] }
  0x32   : > { %v878_v60 = vld [vmem:[%s4794_s10 + $0x20] sm:$0xff]  ;;  %v879_v61 = vld [vmem:[%s4794_s10 + $0x28] sm:$0xff] }
  0x33   : > { %v2649_v6 = vld [vmem:[%s6152_s8 + $0x28] sm:$0xff] }
  0x34   : > { %4178 = vmatprep.subr.mxu1 %v2649_v6 }
  0x35   : > { %986 = vrot.lane.b32.xlu0 %v914_v9, %s6167_s17  ;;  %988 = vrot.lane.b32.xlu1 %v915_v10, %s6167_s17  ;;  %v880_v10 = vld [vmem:[%s4794_s10 + $0x30] sm:$0xff] }
  0x36   : > { %4179 = vmatpush3.msra.mxu1 %v2649_v6 }
  0x39   : > { %990 = vrot.lane.b32.xlu0 %v916_v11, %s6167_s17  ;;  %992 = vrot.lane.b32.xlu1 %v917_v12, %s6167_s17 }
  0x3d   : > { %994 = vrot.lane.b32.xlu0 %v918_v13, %s6167_s17  ;;  %996 = vrot.lane.b32.xlu1 %v919_v14, %s6167_s17 }
  0x41   : > { %998 = vrot.lane.b32.xlu0 %v920_v15, %s6167_s17  ;;  %1000 = vrot.lane.b32.xlu1 %v921_v16, %s6167_s17 }
  0x45   : > { %1002 = vrot.lane.b32.xlu0 %v922_v17, %s6167_s17  ;;  %1004 = vrot.lane.b32.xlu1 %v923_v18, %s6167_s17  ;;  %v881_v17 = vld [vmem:[%s4794_s10 + $0x38] sm:$0xff] }
  0x49   : > { %1006 = vrot.lane.b32.xlu0 %v924_v19, %s6167_s17  ;;  %1008 = vrot.lane.b32.xlu1 %v925_v20, %s6167_s17 }
  0x4d   : > { %1010 = vrot.lane.b32.xlu0 %v926_v21, %s6167_s17  ;;  %1012 = vrot.lane.b32.xlu1 %v927_v22, %s6167_s17 }
  0x51   : > { %1014 = vrot.lane.b32.xlu0 %v928_v23, %s6167_s17  ;;  %1016 = vrot.lane.b32.xlu1 %v929_v24, %s6167_s17 }
  0x55   : > { %1018 = vrot.lane.b32.xlu0 %v930_v25, %s6167_s17  ;;  %1020 = vrot.lane.b32.xlu1 %v931_v26, %s6167_s17 }
  0x59   : > { %1024 = vrot.lane.b32.xlu1 %v933_v27, %s6167_s17  ;;  %1022 = vrot.lane.b32.xlu0 %v932_v28, %s6167_s17 }
  0x5d   : > { %1026 = vrot.lane.b32.xlu0 %v934_v29, %s6167_s17  ;;  %1028 = vrot.lane.b32.xlu1 %v935_v30, %s6167_s17 }
  0x61   : > { %1030 = vrot.lane.b32.xlu0 %v936_v31, %s6167_s17  ;;  %1032 = vrot.lane.b32.xlu1 %v937_v32, %s6167_s17 }
  0x65   : > { %1107 = vrot.lane.b32.xlu1 %v1102_v33, %s6167_s17  ;;  %1105 = vrot.lane.b32.xlu0 %v1101_v34, %s6167_s17  ;;  %s6186_s17 = smov 8  }
  0x97   : > { %v971_v38 = vpop.permute.xlu0 %970  ;;  %v975_v39 = vpop.permute.xlu1 %974 }
  0x98   : > { %v1067_v40 = vsel %vm1066_vm0, %v874_v35, %v971_v38  ;;  %v1069_v42 = vsel %vm1066_vm0, %v876_v36, %v975_v39  ;;  %v882_v38 = vld [vmem:[%s4794_s10 + $0x40] sm:$0xff] }
  0x99   : > { %4072 = vmatprep.mubr.msk.f32.mxu0 %vm1137_vm1, %v1067_v40  ;;  %v1497_v43 = vmul.f32 %v4801_v37, %v1067_v40  ;;  %v1499_v44 = vmul.f32 %v4801_v37, %v1069_v42 }
  0x9b   : > { %v1535_v49 = vadd.f32 %v4807_v41, %v1497_v43  ;;  %v1537_v50 = vadd.f32 %v4807_v41, %v1499_v44  ;;  %v973_v51 = vpop.permute.xlu0 %972  ;;  %v977_v52 = vpop.permute.xlu1 %976 }
  0x9c   : > { %v1068_v54 = vsel %vm1066_vm0, %v875_v45, %v973_v51  ;;  %v1070_v55 = vsel %vm1066_vm0, %v877_v46, %v977_v52 }
  0x9d   : > { %v1567_v56 = vmax.f32 %v1535_v49, 0.0  ;;  %v1569_v57 = vmax.f32 %v1537_v50, 0.0  ;;  %v1498_v58 = vmul.f32 %v4801_v37, %v1068_v54  ;;  %4073 = vmatmul.mubr.msk.f32.vlgmr.msra.gmra.mrb[0].mxu0 %vm1137_vm1, %v1068_v54  ;;  %v1500_v59 = vmul.f32 %v4801_v37, %v1070_v55 }
  0x9e   : > { %4075 = vmatprep.mubr.msk.f32.mxu0 %vm1137_vm1, %v1069_v42 }
  0x9f   : > { %v1663_v62 = vrot.slane %v1567_v56, 7  ;;  %v1666_v63 = vrot.slane %v1569_v57, 7  ;;  %v1536_v0 = vadd.f32 %v4807_v41, %v1498_v58  ;;  %v1538_v1 = vadd.f32 %v4807_v41, %v1500_v59  ;;  %v979_v2 = vpop.permute.xlu0 %978  ;;  %v981_v3 = vpop.permute.xlu1 %980 }
  0xa0   : > { %v1071_v4 = vsel %vm1066_vm0, %v878_v60, %v979_v2  ;;  %v1072_v5 = vsel %vm1066_vm0, %v879_v61, %v981_v3 }
  0xa1   : > { %v4839_v7 = vsel %vm1659_vm2, 0.0, %v1663_v62  ;;  %v1568_v8 = vmax.f32 %v1536_v0, 0.0  ;;  %v1570_v9 = vmax.f32 %v1538_v1, 0.0  ;;  %4076 = vmatmul.mubr.msk.f32.gmra.mrb[2].mxu0 %vm1137_vm1, %v1070_v55  ;;  %v1501_v11 = vmul.f32 %v4801_v37, %v1071_v4  ;;  %v883_v55 = vld [vmem:[%s4794_s10 + $0x48] sm:$0xff] }
  0xa2   : > { %v1502_v12 = vmul.f32 %v4801_v37, %v1072_v5  ;;  %4078 = vmatprep.mubr.msk.f32.mxu0 %vm1137_vm1, %v1071_v4  ;;  %v4847_v13 = vsel %vm1659_vm2, 0.0, %v1666_v63  ;;  %v1843_v19 = vrot.slane %v4839_v7, 1  ;;  %v2020_v43 = vrot.slane %v4839_v7, 2 }
  0xa3   : > { %v1664_v14 = vrot.slane %v1568_v8, 7  ;;  %v983_v15 = vpop.permute.xlu0 %982  ;;  %v985_v16 = vpop.permute.xlu1 %984  ;;  %v1539_v18 = vadd.f32 %v4807_v41, %v1501_v11  ;;  %v1667_v22 = vrot.slane %v1570_v9, 7  ;;  %v1848_v44 = vrot.slane %v4847_v13, 1 }
  0xa4   : > { %v1540_v20 = vadd.f32 %v4807_v41, %v1502_v12  ;;  %v1073_v21 = vsel %vm1066_vm0, %v880_v10, %v983_v15  ;;  %v1074_v29 = vsel %vm1066_vm0, %v881_v17, %v985_v16  ;;  %v2025_v60 = vrot.slane %v4847_v13, 2  ;;  %v885_v17 = vld [vmem:[%s4794_s10 + $0x58] sm:$0xff] }
  0xa5   : > { %v4855_v23 = vsel %vm1659_vm2, %v1663_v62, %v1664_v14  ;;  %v1787_v24 = vsel %vm1659_vm2, %v1664_v14, 0.0  ;;  %4079 = vmatmul.mubr.msk.f32.gmra.mrb[4].mxu0 %vm1137_vm1, %v1072_v5  ;;  %v1503_v25 = vmul.f32 %v4801_v37, %v1073_v21  ;;  %v1571_v26 = vmax.f32 %v1539_v18, 0.0  ;;  %v884_v62 = vld [vmem:[%s4794_s10 + $0x50] sm:$0xff] }
  0xa6   : > { %v1844_v27 = vrot.slane %v4855_v23, 1  ;;  %v1846_v28 = vrot.slane %v1787_v24, 1  ;;  %4081 = vmatprep.mubr.msk.f32.mxu0 %vm1137_vm1, %v1073_v21  ;;  %v1572_v30 = vmax.f32 %v1540_v20, 0.0  ;;  %v2021_v31 = vrot.slane %v4855_v23, 2 }
  0xa7   : > { %v2023_v32 = vrot.slane %v1787_v24, 2  ;;  %v1541_v33 = vadd.f32 %v4807_v41, %v1503_v25  ;;  %v987_v36 = vpop.permute.xlu0 %986  ;;  %v4871_v39 = vsel %vm1659_vm2, %v1666_v63, %v1667_v22  ;;  %v1788_v40 = vsel %vm1659_vm2, %v1667_v22, 0.0  ;;  %v989_v54 = vpop.permute.xlu1 %988  ;;  %v886_v24 = vld [vmem:[%s4794_s10 + $0x60] sm:$0xff] }
  0xa8   : > { %v1847_v34 = vsel %vm1837_vm3, %v1844_v27, %v1846_v28  ;;  %v1845_v35 = vsel %vm1837_vm3, %v1843_v19, %v1844_v27  ;;  %v1669_v42 = vrot.slane %v1571_v26, 7  ;;  %v1504_v45 = vmul.f32 %v4801_v37, %v1074_v29 }
  0xa9   : > { %1924 = vrot.lane.b32.xlu1 %v1847_v34, %s6165_s24  ;;  %1922 = vrot.lane.b32.xlu0 %v1845_v35, %s6165_s24  ;;  %v1670_v46 = vrot.slane %v1572_v30, 7  ;;  %v2024_v47 = vsel %vm2014_vm4, %v2021_v31, %v2023_v32  ;;  %v1573_v48 = vmax.f32 %v1541_v33, 0.0  ;;  %v1075_v49 = vsel %vm1066_vm0, %v882_v38, %v987_v36  ;;  %v887_v33 = vld [vmem:[%s4794_s10 + $0x68] sm:$0xff] }
  0xaa   : > { %4082 = vmatmul.mubr.msk.f32.gmra.mrb[6].mxu0 %vm1137_vm1, %v1074_v29  ;;  %v2022_v50 = vsel %vm2014_vm4, %v2020_v43, %v2021_v31  ;;  %v1849_v51 = vrot.slane %v4871_v39, 1  ;;  %v1851_v52 = vrot.slane %v1788_v40, 1  ;;  %v1542_v53 = vadd.f32 %v4807_v41, %v1504_v45 }
  0xab   : > { %4084 = vmatprep.mubr.msk.f32.mxu0 %vm1137_vm1, %v1075_v49  ;;  %v1505_v56 = vmul.f32 %v4801_v37, %v1075_v49  ;;  %v4889_v57 = vsel %vm1659_vm2, 0.0, %v1669_v42  ;;  %v2026_v59 = vrot.slane %v4871_v39, 2  ;;  %v991_v61 = vpop.permute.xlu0 %990  ;;  %v1672_v63 = vrot.slane %v1573_v48, 7  ;;  %v993_v16 = vpop.permute.xlu1 %992 }
  0xac   : > { %v1574_v58 = vmax.f32 %v1542_v53, 0.0  ;;  %v4895_v0 = vsel %vm1659_vm2, %v1669_v42, %v1670_v46  ;;  %v1789_v1 = vsel %vm1659_vm2, %v1670_v46, 0.0  ;;  %v1076_v2 = vsel %vm1066_vm0, %v883_v55, %v989_v54 }
  0xad   : > { %2101 = vrot.lane.b32.xlu1 %v2024_v47, %s6163_s25  ;;  %2099 = vrot.lane.b32.xlu0 %v2022_v50, %s6163_s25  ;;  %v1852_v3 = vsel %vm1837_vm3, %v1849_v51, %v1851_v52  ;;  %v1850_v4 = vsel %vm1837_vm3, %v1848_v44, %v1849_v51  ;;  %v2028_v5 = vrot.slane %v1788_v40, 2  ;;  %v1506_v6 = vmul.f32 %v4801_v37, %v1076_v2  ;;  %v888_v51 = vld [vmem:[%s4794_s10 + $0x70] sm:$0xff] }
  0xae   : > { %4085 = vmatmul.mubr.msk.f32.gmra.mrb[8].mxu0 %vm1137_vm1, %v1076_v2  ;;  %v1673_v8 = vrot.slane %v1574_v58, 7  ;;  %v1543_v9 = vadd.f32 %v4807_v41, %v1505_v56  ;;  %v1077_v10 = vsel %vm1066_vm0, %v884_v62, %v991_v61  ;;  %v1854_v11 = vrot.slane %v4895_v0, 1  ;;  %v889_v58 = vld [vmem:[%s4794_s10 + $0x78] sm:$0xff] }
  0xaf   : > { %v1856_v12 = vrot.slane %v1789_v1, 1  ;;  %v1853_v14 = vrot.slane %v4889_v57, 1  ;;  %v1544_v15 = vadd.f32 %v4807_v41, %v1506_v6  ;;  %4087 = vmatprep.mubr.msk.f32.mxu0 %vm1137_vm1, %v1077_v10  ;;  %v4913_v18 = vsel %vm1659_vm2, 0.0, %v1672_v63  ;;  %v995_v22 = vpop.permute.xlu0 %994  ;;  %v997_v32 = vpop.permute.xlu1 %996 }
  0xb0   : > { %v2029_v19 = vsel %vm2014_vm4, %v2026_v59, %v2028_v5  ;;  %v2027_v20 = vsel %vm2014_vm4, %v2025_v60, %v2026_v59  ;;  %v1507_v21 = vmul.f32 %v4801_v37, %v1077_v10  ;;  %v1575_v25 = vmax.f32 %v1543_v9, 0.0 }
  0xb1   : > { %1928 = vrot.lane.b32.xlu1 %v1852_v3, %s6165_s24  ;;  %1926 = vrot.lane.b32.xlu0 %v1850_v4, %s6165_s24  ;;  %v1576_v26 = vmax.f32 %v1544_v15, 0.0  ;;  %v4922_v27 = vsel %vm1659_vm2, %v1672_v63, %v1673_v8  ;;  %v1078_v28 = vsel %vm1066_vm0, %v885_v17, %v993_v16  ;;  %v1857_v29 = vsel %vm1837_vm3, %v1854_v11, %v1856_v12 }
  0xb2   : > { %v1855_v30 = vsel %vm1837_vm3, %v1853_v14, %v1854_v11  ;;  %v1508_v31 = vmul.f32 %v4801_v37, %v1078_v28  ;;  %4088 = vmatmul.mubr.msk.f32.gmra.mrb[10].mxu0 %vm1137_vm1, %v1078_v28  ;;  %v2031_v34 = vrot.slane %v4895_v0, 2  ;;  %v2033_v35 = vrot.slane %v1789_v1, 2  ;;  %v890_v14 = vld [vmem:[%s4794_s10 + $0x80] sm:$0xff] }
  0xb3   : > { %v1790_v36 = vsel %vm1659_vm2, %v1673_v8, 0.0  ;;  %v1079_v38 = vsel %vm1066_vm0, %v886_v24, %v995_v22  ;;  %v2030_v40 = vrot.slane %v4889_v57, 2  ;;  %v1545_v42 = vadd.f32 %v4807_v41, %v1507_v21  ;;  %v999_v50 = vpop.permute.xlu0 %998  ;;  %v1001_v56 = vpop.permute.xlu1 %1000  ;;  %v891_v21 = vld [vmem:[%s4794_s10 + $0x88] sm:$0xff] }
  0xb4   : > { %v1859_v43 = vrot.slane %v4922_v27, 1  ;;  %v1858_v44 = vrot.slane %v4913_v18, 1  ;;  %4090 = vmatprep.mubr.msk.f32.mxu0 %vm1137_vm1, %v1079_v38  ;;  %v1675_v45 = vrot.slane %v1575_v25, 7  ;;  %v1676_v46 = vrot.slane %v1576_v26, 7 }
  0xb5   : > { %2105 = vrot.lane.b32.xlu1 %v2029_v19, %s6163_s25  ;;  %2103 = vrot.lane.b32.xlu0 %v2027_v20, %s6163_s25  ;;  %v1080_v47 = vsel %vm1066_vm0, %v887_v33, %v997_v32  ;;  %v1861_v48 = vrot.slane %v1790_v36, 1  ;;  %v1546_v49 = vadd.f32 %v4807_v41, %v1508_v31  ;;  %v2034_v52 = vsel %vm2014_vm4, %v2031_v34, %v2033_v35 }
  0xb6   : > { %4091 = vmatmul.mubr.msk.f32.gmra.mrb[12].mxu0 %vm1137_vm1, %v1080_v47  ;;  %v2032_v53 = vsel %vm2014_vm4, %v2030_v40, %v2031_v34  ;;  %v1577_v54 = vmax.f32 %v1545_v42, 0.0  ;;  %v1860_v55 = vsel %vm1837_vm3, %v1858_v44, %v1859_v43  ;;  %v4949_v59 = vsel %vm1659_vm2, 0.0, %v1675_v45  ;;  %v892_v34 = vld [vmem:[%s4794_s10 + $0x90] sm:$0xff] }
  0xb7   : > { %v1509_v60 = vmul.f32 %v4801_v37, %v1079_v38  ;;  %v4955_v61 = vsel %vm1659_vm2, %v1675_v45, %v1676_v46  ;;  %v1081_v62 = vsel %vm1066_vm0, %v888_v51, %v999_v50  ;;  %v1862_v63 = vsel %vm1837_vm3, %v1859_v43, %v1861_v48  ;;  %v1003_v12 = vpop.permute.xlu0 %1002  ;;  %v1005_v20 = vpop.permute.xlu1 %1004 }
  0xb8   : > { %v1578_v1 = vmax.f32 %v1546_v49, 0.0  ;;  %v1791_v2 = vsel %vm1659_vm2, %v1676_v46, 0.0  ;;  %v1510_v3 = vmul.f32 %v4801_v37, %v1080_v47  ;;  %4093 = vmatprep.mubr.msk.f32.mxu0 %vm1137_vm1, %v1081_v62  ;;  %v2036_v4 = vrot.slane %v4922_v27, 2  ;;  %v893_v47 = vld [vmem:[%s4794_s10 + $0x98] sm:$0xff] }
  0xb9   : > { %1932 = vrot.lane.b32.xlu1 %v1857_v29, %s6165_s24  ;;  %1930 = vrot.lane.b32.xlu0 %v1855_v30, %s6165_s24  ;;  %v2038_v5 = vrot.slane %v1790_v36, 2  ;;  %v1082_v6 = vsel %vm1066_vm0, %v889_v58, %v1001_v56  ;;  %v1678_v8 = vrot.slane %v1577_v54, 7  ;;  %v2035_v9 = vrot.slane %v4913_v18, 2  ;;  %v894_v58 = vld [vmem:[%s4794_s10 + $0xa0] sm:$0xff] }
  0xba   : > { %v1864_v10 = vrot.slane %v4955_v61, 1  ;;  %v1863_v11 = vrot.slane %v4949_v59, 1  ;;  %4094 = vmatmul.mubr.msk.f32.gmra.mrb[14].mxu0 %vm1137_vm1, %v1082_v6  ;;  %v1547_v15 = vadd.f32 %v4807_v41, %v1509_v60  ;;  %v1866_v16 = vrot.slane %v1791_v2, 1 }
  0xbb   : > { %v1679_v17 = vrot.slane %v1578_v1, 7  ;;  %v1548_v19 = vadd.f32 %v4807_v41, %v1510_v3  ;;  %v1083_v22 = vsel %vm1066_vm0, %v890_v14, %v1003_v12  ;;  %v4976_v24 = vsel %vm1659_vm2, 0.0, %v1678_v8  ;;  %v1007_v33 = vpop.permute.xlu0 %1006  ;;  %v1009_v46 = vpop.permute.xlu1 %1008 }
  0xbc   : > { %v2039_v25 = vsel %vm2014_vm4, %v2036_v4, %v2038_v5  ;;  %v2037_v26 = vsel %vm2014_vm4, %v2035_v9, %v2036_v4  ;;  %v1865_v28 = vsel %vm1837_vm3, %v1863_v11, %v1864_v10  ;;  %4096 = vmatprep.mubr.msk.f32.mxu0 %vm1137_vm1, %v1083_v22  ;;  %v1579_v29 = vmax.f32 %v1547_v15, 0.0  ;;  %v895_v9 = vld [vmem:[%s4794_s10 + $0xa8] sm:$0xff] }
  0xbd   : > { %2109 = vrot.lane.b32.xlu1 %v2034_v52, %s6163_s25  ;;  %2107 = vrot.lane.b32.xlu0 %v2032_v53, %s6163_s25  ;;  %v1867_v30 = vsel %vm1837_vm3, %v1864_v10, %v1866_v16  ;;  %v1511_v31 = vmul.f32 %v4801_v37, %v1081_v62  ;;  %v1084_v32 = vsel %vm1066_vm0, %v891_v21, %v1005_v20  ;;  %v1580_v35 = vmax.f32 %v1548_v19, 0.0 }
  0xbe   : > { %v4989_v36 = vsel %vm1659_vm2, %v1678_v8, %v1679_v17  ;;  %v1792_v38 = vsel %vm1659_vm2, %v1679_v17, 0.0  ;;  %v1512_v40 = vmul.f32 %v4801_v37, %v1082_v6  ;;  %4097 = vmatmul.mubr.msk.f32.gmra.mrb[16].mxu0 %vm1137_vm1, %v1084_v32  ;;  %v2041_v42 = vrot.slane %v4955_v61, 2 }
  0xbf   : > { %v2043_v43 = vrot.slane %v1791_v2, 2  ;;  %v2040_v44 = vrot.slane %v4949_v59, 2  ;;  %v1085_v45 = vsel %vm1066_vm0, %v892_v34, %v1007_v33  ;;  %v1549_v48 = vadd.f32 %v4807_v41, %v1511_v31  ;;  %v1011_v56 = vpop.permute.xlu0 %1010  ;;  %v1013_v8 = vpop.permute.xlu1 %1012 }
  0xc0   : > { %v1869_v49 = vrot.slane %v4989_v36, 1  ;;  %v1871_v50 = vrot.slane %v1792_v38, 1  ;;  %v1868_v51 = vrot.slane %v4976_v24, 1  ;;  %v1681_v52 = vrot.slane %v1579_v29, 7  ;;  %4099 = vmatprep.mubr.msk.f32.mxu0 %vm1137_vm1, %v1085_v45 }
  0xc1   : > { %1936 = vrot.lane.b32.xlu1 %v1862_v63, %s6165_s24  ;;  %1934 = vrot.lane.b32.xlu0 %v1860_v55, %s6165_s24  ;;  %v1682_v53 = vrot.slane %v1580_v35, 7  ;;  %v1550_v54 = vadd.f32 %v4807_v41, %v1512_v40  ;;  %v1086_v55 = vsel %vm1066_vm0, %v893_v47, %v1009_v46  ;;  %v2044_v60 = vsel %vm2014_vm4, %v2041_v42, %v2043_v43  ;;  %v897_v35 = vld [vmem:[%s4794_s10 + $0xb8] sm:$0xff] }
  0xc2   : > { %v2042_v62 = vsel %vm2014_vm4, %v2040_v44, %v2041_v42  ;;  %4100 = vmatmul.mubr.msk.f32.gmra.mrb[18].mxu0 %vm1137_vm1, %v1086_v55  ;;  %v1581_v63 = vmax.f32 %v1549_v48, 0.0  ;;  %v1872_v1 = vsel %vm1837_vm3, %v1869_v49, %v1871_v50  ;;  %v1870_v2 = vsel %vm1837_vm3, %v1868_v51, %v1869_v49  ;;  %v898_v48 = vld [vmem:[%s4794_s10 + $0xc0] sm:$0xff] }
  0xc3   : > { %v1582_v3 = vmax.f32 %v1550_v54, 0.0  ;;  %v1513_v4 = vmul.f32 %v4801_v37, %v1083_v22  ;;  %v5016_v5 = vsel %vm1659_vm2, %v1681_v52, %v1682_v53  ;;  %v5019_v6 = vsel %vm1066_vm0, %v894_v58, %v1011_v56  ;;  %v1015_v21 = vpop.permute.xlu0 %1014  ;;  %v896_v22 = vld [vmem:[%s4794_s10 + $0xb0] sm:$0xff]  ;;  %v1017_v34 = vpop.permute.xlu1 %1016 }
  0xc4   : > { %v5023_v10 = vsel %vm1659_vm2, 0.0, %v1681_v52  ;;  %v1793_v11 = vsel %vm1659_vm2, %v1682_v53, 0.0  ;;  %v1514_v12 = vmul.f32 %v4801_v37, %v1084_v32  ;;  %4102 = vmatprep.mubr.msk.f32.mxu0 %vm1137_vm1, %v5019_v6  ;;  %v2046_v14 = vrot.slane %v4989_v36, 2 }
  0xc5   : > { %2113 = vrot.lane.b32.xlu1 %v2039_v25, %s6163_s25  ;;  %2111 = vrot.lane.b32.xlu0 %v2037_v26, %s6163_s25  ;;  %v2048_v15 = vrot.slane %v1792_v38, 2  ;;  %v2045_v16 = vrot.slane %v4976_v24, 2  ;;  %v1684_v17 = vrot.slane %v1581_v63, 7  ;;  %v1874_v19 = vrot.slane %v5016_v5, 1 }
  0xc6   : > { %v1088_v20 = vsel %vm1066_vm0, %v895_v9, %v1013_v8  ;;  %v1685_v25 = vrot.slane %v1582_v3, 7  ;;  %v1551_v26 = vadd.f32 %v4807_v41, %v1513_v4  ;;  %v1873_v29 = vrot.slane %v5023_v10, 1 }
  0xc7   : > { %4103 = vmatmul.mubr.msk.f32.gmra.mrb[20].mxu0 %vm1137_vm1, %v1088_v20  ;;  %v2049_v31 = vsel %vm2014_vm4, %v2046_v14, %v2048_v15  ;;  %v2047_v32 = vsel %vm2014_vm4, %v2045_v16, %v2046_v14  ;;  %v5043_v33 = vsel %vm1066_vm0, %v896_v22, %v1015_v21  ;;  %v5047_v38 = vsel %vm1659_vm2, 0.0, %v1684_v17  ;;  %v1019_v47 = vpop.permute.xlu0 %1018 }
  0xc8   : > { %v1515_v40 = vmul.f32 %v4801_v37, %v1085_v45  ;;  %v1583_v42 = vmax.f32 %v1551_v26, 0.0  ;;  %v1875_v44 = vsel %vm1837_vm3, %v1873_v29, %v1874_v19  ;;  %v5055_v46 = vsel %vm1659_vm2, %v1684_v17, %v1685_v25  ;;  %4105 = vmatprep.mubr.msk.f32.mxu0 %vm1137_vm1, %v5043_v33 }
  0xc9   : > { %1940 = vrot.lane.b32.xlu1 %v1867_v30, %s6165_s24  ;;  %1938 = vrot.lane.b32.xlu0 %v1865_v28, %s6165_s24  ;;  %v1876_v28 = vrot.slane %v1793_v11, 1  ;;  %v1552_v30 = vadd.f32 %v4807_v41, %v1514_v12  ;;  %v1794_v50 = vsel %vm1659_vm2, %v1685_v25, 0.0  ;;  %v1516_v51 = vmul.f32 %v4801_v37, %v1086_v55 }
  0xca   : > { %v5063_v45 = vsel %vm1066_vm0, %v897_v35, %v1017_v34  ;;  %v2051_v52 = vrot.slane %v5016_v5, 2  ;;  %v2053_v53 = vrot.slane %v1793_v11, 2  ;;  %v2050_v54 = vrot.slane %v5023_v10, 2 }
  0xcb   : > { %v1877_v43 = vsel %vm1837_vm3, %v1874_v19, %v1876_v28  ;;  %v1584_v49 = vmax.f32 %v1552_v30, 0.0  ;;  %4106 = vmatmul.mubr.msk.f32.gmra.mrb[22].mxu0 %vm1137_vm1, %v5063_v45  ;;  %v1553_v56 = vadd.f32 %v4807_v41, %v1515_v40  ;;  %v5073_v58 = vsel %vm1066_vm0, %v898_v48, %v1019_v47  ;;  %v1023_v11 = vpop.permute.xlu0 %1022  ;;  %v901_v48 = vld [vmem:[%s4794_s10 + $0xd8] sm:$0xff] }
  0xcc   : > { %v1687_v55 = vrot.slane %v1583_v42, 7  ;;  %v1878_v63 = vrot.slane %v5047_v38, 1  ;;  %4108 = vmatprep.mubr.msk.f32.mxu0 %vm1137_vm1, %v5073_v58  ;;  %v1554_v4 = vadd.f32 %v4807_v41, %v1516_v51  ;;  %v2054_v8 = vsel %vm2014_vm4, %v2051_v52, %v2053_v53  ;;  %v900_v42 = vld [vmem:[%s4794_s10 + $0xd0] sm:$0xff] }
  0xcd   : > { %2117 = vrot.lane.b32.xlu1 %v2044_v60, %s6163_s25  ;;  %2115 = vrot.lane.b32.xlu0 %v2042_v62, %s6163_s25  ;;  %v1879_v60 = vrot.slane %v5055_v46, 1  ;;  %v1881_v62 = vrot.slane %v1794_v50, 1  ;;  %v1688_v3 = vrot.slane %v1584_v49, 7  ;;  %v2052_v9 = vsel %vm2014_vm4, %v2050_v54, %v2051_v52 }
  0xce   : > { %v1585_v12 = vmax.f32 %v1553_v56, 0.0  ;;  %v1517_v14 = vmul.f32 %v4801_v37, %v5019_v6  ;;  %v5091_v16 = vsel %vm1659_vm2, 0.0, %v1687_v55  ;;  %v1586_v21 = vmax.f32 %v1554_v4, 0.0 }
  0xcf   : > { %v1882_v17 = vsel %vm1837_vm3, %v1879_v60, %v1881_v62  ;;  %v1880_v19 = vsel %vm1837_vm3, %v1878_v63, %v1879_v60  ;;  %v5098_v22 = vsel %vm1659_vm2, %v1687_v55, %v1688_v3  ;;  %v1795_v6 = vsel %vm1659_vm2, %v1688_v3, 0.0  ;;  %v903_v55 = vld [vmem:[%s4794_s10 + $0xe8] sm:$0xff]  ;;  %v904_v3 = vld [vmem:[%s4794_s10 + $0xf0] sm:$0xff] }
  0xd0   : > { %v1518_v25 = vmul.f32 %v4801_v37, %v1088_v20  ;;  %v2056_v28 = vrot.slane %v5055_v46, 2  ;;  %v2058_v29 = vrot.slane %v1794_v50, 2  ;;  %v2055_v30 = vrot.slane %v5047_v38, 2 }
  0xd1   : > { %1944 = vrot.lane.b32.xlu1 %v1872_v1, %s6165_s24  ;;  %1942 = vrot.lane.b32.xlu0 %v1870_v2, %s6165_s24  ;;  %v1021_v1 = vpop.permute.xlu1 %1020  ;;  %v899_v2 = vld [vmem:[%s4794_s10 + $0xc8] sm:$0xff]  ;;  %v1555_v34 = vadd.f32 %v4807_v41, %v1517_v14  ;;  %v1884_v35 = vrot.slane %v5098_v22, 1  ;;  %v1886_v40 = vrot.slane %v1795_v6, 1  ;;  %v1883_v20 = vrot.slane %v5091_v16, 1 }
  0xd2   : > { %v5088_v15 = vsel %vm1066_vm0, %v899_v2, %v1021_v1  ;;  %v1556_v47 = vadd.f32 %v4807_v41, %v1518_v25  ;;  %v2059_v50 = vsel %vm2014_vm4, %v2056_v28, %v2058_v29  ;;  %v2057_v51 = vsel %vm2014_vm4, %v2055_v30, %v2056_v28  ;;  %v905_v25 = vld [vmem:[%s4794_s10 + $0xf8] sm:$0xff] }
  0xd3   : > { %4109 = vmatmul.mubr.msk.f32.gmra.mrb[24].mxu0 %vm1137_vm1, %v5088_v15  ;;  %v1587_v53 = vmax.f32 %v1555_v34, 0.0  ;;  %v5121_v54 = vsel %vm1066_vm0, %v900_v42, %v1023_v11  ;;  %v1887_v60 = vsel %vm1837_vm3, %v1884_v35, %v1886_v40  ;;  %v1885_v62 = vsel %vm1837_vm3, %v1883_v20, %v1884_v35 }
  0xd4   : > { %v1519_v63 = vmul.f32 %v4801_v37, %v5043_v33  ;;  %4111 = vmatprep.mubr.msk.f32.mxu0 %vm1137_vm1, %v5121_v54  ;;  %v1588_v4 = vmax.f32 %v1556_v47, 0.0  ;;  %v1520_v11 = vmul.f32 %v4801_v37, %v5063_v45  ;;  %v2061_v33 = vrot.slane %v5098_v22, 2 }
  0xd5   : > { %2121 = vrot.lane.b32.xlu1 %v2049_v31, %s6163_s25  ;;  %2119 = vrot.lane.b32.xlu0 %v2047_v32, %s6163_s25  ;;  %v1025_v26 = vpop.permute.xlu1 %1024  ;;  %v1027_v31 = vpop.permute.xlu0 %1026  ;;  %v1690_v32 = vrot.slane %v1585_v12, 7  ;;  %v2063_v12 = vrot.slane %v1795_v6, 2  ;;  %v2060_v14 = vrot.slane %v5091_v16, 2 }
  0xd6   : > { %v5132_v1 = vsel %vm1066_vm0, %v901_v48, %v1025_v26  ;;  %v1557_v6 = vadd.f32 %v4807_v41, %v1519_v63  ;;  %v1694_v30 = vrot.slane %v1588_v4, 7 }
  0xd7   : > { %v5116_v52 = vsel %vm1659_vm2, 0.0, %v1690_v32  ;;  %4112 = vmatmul.mubr.msk.f32.gmra.mrb[26].mxu0 %vm1137_vm1, %v5132_v1  ;;  %v2062_v34 = vsel %vm2014_vm4, %v2060_v14, %v2061_v33 }
  0xd8   : > { %v1888_v29 = vrot.slane %v5116_v52, 1  ;;  %v1589_v20 = vmax.f32 %v1557_v6, 0.0 }
  0xd9   : > { %1948 = vrot.lane.b32.xlu1 %v1877_v43, %s6165_s24  ;;  %1946 = vrot.lane.b32.xlu0 %v1875_v44, %s6165_s24  ;;  %v902_v43 = vld [vmem:[%s4794_s10 + $0xe0] sm:$0xff]  ;;  %v1691_v44 = vrot.slane %v1586_v21, 7  ;;  %v1029_v49 = vpop.permute.xlu1 %1028  ;;  %v1031_v2 = vpop.permute.xlu0 %1030  ;;  %s6188_s10 = sadd.s32 240, %s4712_s29  ;;  %s6053_s29 = sand.u32 1, %s4549_s19  }
  0xda   : > { %v5124_v56 = vsel %vm1066_vm0, %v902_v43, %v1027_v31  ;;  %v5155_v45 = vsel %vm1066_vm0, %v904_v3, %v1031_v2  ;;  %v1558_v31 = vadd.f32 %v4807_v41, %v1520_v11 }
  0xdb   : > { %4114 = vmatprep.mubr.msk.f32.mxu0 %vm1137_vm1, %v5124_v56 }
  0xdc   : > { %v1590_v47 = vmax.f32 %v1558_v31, 0.0 }
  0xdd   : > { %2125 = vrot.lane.b32.xlu1 %v2054_v8, %s6163_s25  ;;  %2123 = vrot.lane.b32.xlu0 %v2052_v9, %s6163_s25  ;;  %v5138_v8 = vsel %vm1659_vm2, %v1690_v32, %v1691_v44  ;;  %v1796_v9 = vsel %vm1659_vm2, %v1691_v44, 0.0  ;;  %v1033_v21 = vpop.permute.xlu1 %1032  ;;  %v2064_v32 = vsel %vm2014_vm4, %v2061_v33, %v2063_v12  ;;  %v1521_v44 = vmul.f32 %v4801_v37, %v5073_v58 }
  0xde   : > { %v1889_v26 = vrot.slane %v5138_v8, 1  ;;  %v1891_v28 = vrot.slane %v1796_v9, 1  ;;  %v5167_v35 = vsel %vm1066_vm0, %v905_v25, %v1033_v21  ;;  %v1697_v2 = vrot.slane %v1590_v47, 7 }
  0xdf   : > { %v1559_v58 = vadd.f32 %v4807_v41, %v1521_v44 }
  0xe0   : > { %v1892_v42 = vsel %vm1837_vm3, %v1889_v26, %v1891_v28  ;;  %v1890_v43 = vsel %vm1837_vm3, %v1888_v29, %v1889_v26  ;;  %v1798_v25 = vsel %vm1659_vm2, %v1697_v2, 0.0 }
  0xe1   : > { %1952 = vrot.lane.b32.xlu1 %v1882_v17, %s6165_s24  ;;  %1950 = vrot.lane.b32.xlu0 %v1880_v19, %s6165_s24  ;;  %v5148_v17 = vsel %vm1066_vm0, %v903_v55, %v1029_v49  ;;  %v1693_v19 = vrot.slane %v1587_v53, 7  ;;  %v1797_v49 = vsel %vm1659_vm2, %v1694_v30, 0.0  ;;  %v2068_v53 = vrot.slane %v1796_v9, 2 }
  0xe2   : > { %4115 = vmatmul.mubr.msk.f32.gmra.mrb[28].mxu0 %vm1137_vm1, %v5148_v17  ;;  %v2065_v55 = vrot.slane %v5116_v52, 2  ;;  %v1591_v11 = vmax.f32 %v1559_v58, 0.0  ;;  %v2073_v26 = vrot.slane %v1797_v49, 2  ;;  %v1901_v31 = vrot.slane %v1798_v25, 1 }
  0xe3   : > { %4117 = vmatprep.mubr.msk.f32.mxu0 %vm1137_vm1, %v5155_v45  ;;  %v5172_v40 = vsel %vm1659_vm2, 0.0, %v1693_v19  ;;  %v5181_v48 = vsel %vm1659_vm2, %v1693_v19, %v1694_v30  ;;  %v2078_v58 = vrot.slane %v1798_v25, 2 }
  0xe4   : > { %v1893_v63 = vrot.slane %v5172_v40, 1  ;;  %v2071_v6 = vrot.slane %v5181_v48, 2  ;;  %v2070_v28 = vrot.slane %v5172_v40, 2  ;;  %v1699_v29 = vrot.slane %v1591_v11, 7 }
  0xe5   : > { %2129 = vrot.lane.b32.xlu1 %v2059_v50, %s6163_s25  ;;  %2127 = vrot.lane.b32.xlu0 %v2057_v51, %s6163_s25  ;;  %v1522_v50 = vmul.f32 %v4801_v37, %v5088_v15  ;;  %v2066_v51 = vrot.slane %v5138_v8, 2  ;;  %v1696_v15 = vrot.slane %v1589_v20, 7  ;;  %v1524_v20 = vmul.f32 %v4801_v37, %v5132_v1 }
  0xe6   : > { %4118 = vmatmul.mubr.msk.f32.gmra.mrb[30].mxu0 %vm1137_vm1, %v5167_v35  ;;  %v2072_v44 = vsel %vm2014_vm4, %v2070_v28, %v2071_v6  ;;  %v5224_v47 = vsel %vm1659_vm2, 0.0, %v1699_v29  ;;  %v1100_v28 = vld [vmem:[%s785_s22 + $0x8] sm:$0xff] }
  0xe7   : > { %v1560_v3 = vadd.f32 %v4807_v41, %v1522_v50  ;;  %v2069_v4 = vsel %vm2014_vm4, %v2066_v51, %v2068_v53  ;;  %v2067_v9 = vsel %vm2014_vm4, %v2065_v55, %v2066_v51  ;;  %v5203_v14 = vsel %vm1659_vm2, 0.0, %v1696_v15 }
  0xe8   : > { %v5206_v21 = vsel %vm1659_vm2, %v1696_v15, %v1697_v2  ;;  %v1562_v1 = vadd.f32 %v4807_v41, %v1524_v20  ;;  %v1903_v15 = vrot.slane %v5224_v47, 1  ;;  %v1525_v2 = vmul.f32 %v4801_v37, %v5124_v56 }
  0xe9   : > { %1956 = vrot.lane.b32.xlu1 %v1887_v60, %s6165_s24  ;;  %1954 = vrot.lane.b32.xlu0 %v1885_v62, %s6165_s24  ;;  %v1894_v60 = vrot.slane %v5181_v48, 1  ;;  %v1896_v62 = vrot.slane %v1797_v49, 1  ;;  %v1592_v19 = vmax.f32 %v1560_v3, 0.0  ;;  %v1899_v30 = vrot.slane %v5206_v21, 1 }
  0xea   : > { %v2076_v55 = vrot.slane %v5206_v21, 2  ;;  %v1594_v3 = vmax.f32 %v1562_v1, 0.0 }
  0xeb   : > { %v1897_v33 = vsel %vm1837_vm3, %v1894_v60, %v1896_v62  ;;  %v1895_v12 = vsel %vm1837_vm3, %v1893_v63, %v1894_v60  ;;  %v1902_v49 = vsel %vm1837_vm3, %v1899_v30, %v1901_v31  ;;  %v2075_v60 = vrot.slane %v5203_v14, 2 }
  0xec   : > { %v2079_v11 = vsel %vm2014_vm4, %v2076_v55, %v2078_v58  ;;  %v1528_v58 = vmul.f32 %v4801_v37, %v5167_v35  ;;  %v2256_v35 = vld [vmem:[%s6152_s8] sm:$0xff] }
  0xed   : > { %2133 = vrot.lane.b32.xlu1 %v2064_v32, %s6163_s25  ;;  %2131 = vrot.lane.b32.xlu0 %v2062_v34, %s6163_s25  ;;  %v1898_v32 = vrot.slane %v5203_v14, 1  ;;  %v1700_v34 = vrot.slane %v1592_v19, 7  ;;  %v1563_v19 = vadd.f32 %v4807_v41, %v1525_v2 }
  0xef   : > { %v1900_v50 = vsel %vm1837_vm3, %v1898_v32, %v1899_v30  ;;  %v1799_v53 = vsel %vm1659_vm2, %v1700_v34, 0.0  ;;  %v1099_v30 = vld [vmem:[%s785_s22] sm:$0xff]  ;;  %v1595_v20 = vmax.f32 %v1563_v19, 0.0  ;;  %s6185_s22 = smov 4  }
  0xf0   : > { %v1906_v63 = vrot.slane %v1799_v53, 1  ;;  %v2083_v32 = vrot.slane %v1799_v53, 2 }
  0xf1   : > { %1960 = vrot.lane.b32.xlu1 %v1892_v42, %s6165_s24  ;;  %1958 = vrot.lane.b32.xlu0 %v1890_v43, %s6165_s24  ;;  %v1523_v42 = vmul.f32 %v4801_v37, %v5121_v54  ;;  %v2074_v43 = vsel %vm2014_vm4, %v2071_v6, %v2073_v26  ;;  %v5231_v54 = vsel %vm1659_vm2, %v1699_v29, %v1700_v34  ;;  %v1108_v26 = vpop.permute.xlu1 %1107  ;;  %v1106_v29 = vpop.permute.xlu0 %1105  ;;  %v2080_v34 = vrot.slane %v5224_v47, 2 }
  0xf2   : > { %v1904_v62 = vrot.slane %v5231_v54, 1  ;;  %v2081_v31 = vrot.slane %v5231_v54, 2 }
  0xf3   : > { %v1561_v51 = vadd.f32 %v4807_v41, %v1523_v42  ;;  %v1112_v42 = vsel %vm1066_vm0, %v1100_v28, %v1108_v26 }
  0xf4   : > { %v1907_v56 = vsel %vm1837_vm3, %v1904_v62, %v1906_v63  ;;  %v2082_v53 = vsel %vm2014_vm4, %v2080_v34, %v2081_v31  ;;  %v1116_v63 = vld [vmem:[%s847_s27 + $0x8] sm:$0xff] }
  0xf5   : > { %2137 = vrot.lane.b32.xlu1 %v2069_v4, %s6163_s25  ;;  %2135 = vrot.lane.b32.xlu0 %v2067_v9, %s6163_s25  ;;  %v1593_v4 = vmax.f32 %v1561_v51, 0.0  ;;  %v1526_v9 = vmul.f32 %v4801_v37, %v5148_v17  ;;  %v1703_v17 = vrot.slane %v1594_v3, 7  ;;  %v2084_v51 = vsel %vm2014_vm4, %v2081_v31, %v2083_v32 }
  0xf7   : > { %v1702_v25 = vrot.slane %v1593_v4, 7  ;;  %v1564_v6 = vadd.f32 %v4807_v41, %v1526_v9  ;;  %v1800_v1 = vsel %vm1659_vm2, %v1703_v17, 0.0  ;;  %v1705_v9 = vrot.slane %v1595_v20, 7 }
  0xf8   : > { %v1911_v3 = vrot.slane %v1800_v1, 1  ;;  %v2088_v26 = vrot.slane %v1800_v1, 2 }
  0xf9   : > { %1964 = vrot.lane.b32.xlu1 %v1897_v33, %s6165_s24  ;;  %1962 = vrot.lane.b32.xlu0 %v1895_v12, %s6165_s24  ;;  %v2077_v33 = vsel %vm2014_vm4, %v2075_v60, %v2076_v55  ;;  %v1905_v12 = vsel %vm1837_vm3, %v1903_v15, %v1904_v62  ;;  %v1527_v55 = vmul.f32 %v4801_v37, %v5155_v45  ;;  %v1115_v15 = vld [vmem:[%s847_s27] sm:$0xff]  ;;  %v5312_v32 = vsel %vm1659_vm2, 0.0, %v1705_v9  ;;  %s755_s27 = scalar_lea.vmem [#allocation2], %s6053_s29 }
  0xfa   : > { %v1600_v60 = vmul.f32 %v4801_v37, %v1112_v42 }
  0xfd   : > { %2141 = vrot.lane.b32.xlu1 %v2074_v43, %s6163_s25  ;;  %2139 = vrot.lane.b32.xlu0 %v2072_v44, %s6163_s25  ;;  %v1111_v43 = vsel %vm1066_vm0, %v1099_v30, %v1106_v29  ;;  %v5264_v44 = vsel %vm1659_vm2, 0.0, %v1702_v25 }
  0xfe   : > { %v1599_v62 = vmul.f32 %v4801_v37, %v1111_v43  ;;  %v1908_v4 = vrot.slane %v5264_v44, 1  ;;  %v2941_v37 = vld [vmem:[%s6152_s8 + $0x30] sm:$0xff]  ;;  %v2085_v31 = vrot.slane %v5264_v44, 2 }
 0x101   : > { %1968 = vrot.lane.b32.xlu1 %v1902_v49, %s6165_s24  ;;  %1966 = vrot.lane.b32.xlu0 %v1900_v50, %s6165_s24  ;;  %v1596_v49 = vmax.f32 %v1564_v6, 0.0  ;;  %v5272_v50 = vsel %vm1659_vm2, %v1702_v25, %v1703_v17  ;;  %v2942_v17 = vld [vmem:[%s6152_s8 + $0x38] sm:$0xff]  ;;  %v1602_v25 = vadd.f32 %v4807_v41, %v1600_v60  ;;  %v1601_v6 = vadd.f32 %v4807_v41, %v1599_v62 }
 0x102   : > { %v1909_v2 = vrot.slane %v5272_v50, 1  ;;  %v5306_v28 = vpack.c.bf16 %v2942_v17, %v2941_v37 }
 0x103   : > { %v1706_v45 = vrot.slane %v1596_v49, 7  ;;  %v1604_v43 = vmax.f32 %v1602_v25, 0.0  ;;  %v1603_v49 = vmax.f32 %v1601_v6, 0.0 }
 0x104   : > { %v1912_v29 = vsel %vm1837_vm3, %v1909_v2, %v1911_v3  ;;  %v1910_v30 = vsel %vm1837_vm3, %v1908_v4, %v1909_v2  ;;  %4291 = vmatprep.subr.bf16.mxu1 %v5306_v28 }
 0x105   : > { %2145 = vrot.lane.b32.xlu1 %v2079_v11, %s6163_s25  ;;  %2143 = vrot.lane.b32.xlu0 %v2077_v33, %s6163_s25  ;;  %v2257_v11 = vld [vmem:[%s6152_s8 + $0x8] sm:$0xff]  ;;  %v1565_v33 = vadd.f32 %v4807_v41, %v1527_v55  ;;  %v5315_v34 = vsel %vm1659_vm2, %v1705_v9, %v1706_v45  ;;  %v1801_v20 = vsel %vm1659_vm2, %v1706_v45, 0.0 }
 0x106   : > { %v4282_v19 = vpack.c.bf16 %v2257_v11, %v2256_v35  ;;  %v1916_v55 = vrot.slane %v1801_v20, 1  ;;  %v2091_v4 = vrot.slane %v5315_v34, 2  ;;  %v2093_v9 = vrot.slane %v1801_v20, 2 }
 0x107   : > { %v2090_v11 = vrot.slane %v5312_v32, 2 }
 0x108   : > { %4283 = vmatprep.subr.bf16.mxu0 %v4282_v19  ;;  %v2094_v17 = vsel %vm2014_vm4, %v2091_v4, %v2093_v9 }
 0x109   : > { %1972 = vrot.lane.b32.xlu1 %v1907_v56, %s6165_s24  ;;  %1970 = vrot.lane.b32.xlu0 %v1905_v12, %s6165_s24  ;;  %v1566_v56 = vadd.f32 %v4807_v41, %v1528_v58  ;;  %v2086_v12 = vrot.slane %v5272_v50, 2  ;;  %v1597_v41 = vmax.f32 %v1565_v33, 0.0  ;;  %v1913_v58 = vrot.slane %v5312_v32, 1  ;;  %s6187_s24 = smov 16  }
 0x10a   : > { %4285 = vmatpush3.bf16.msra.mxu0 %v4282_v19 }
 0x10b   : > { %v1598_v42 = vmax.f32 %v1566_v56, 0.0  ;;  %v2089_v1 = vsel %vm2014_vm4, %v2086_v12, %v2088_v26  ;;  %v1708_v60 = vrot.slane %v1597_v41, 7 }
 0x10d   : > { %2149 = vrot.lane.b32.xlu1 %v2084_v51, %s6163_s25  ;;  %2147 = vrot.lane.b32.xlu0 %v2082_v53, %s6163_s25  ;;  %v2087_v51 = vsel %vm2014_vm4, %v2085_v31, %v2086_v12  ;;  %v1914_v53 = vrot.slane %v5315_v34, 1  ;;  %v1709_v62 = vrot.slane %v1598_v42, 7  ;;  %v5335_v33 = vsel %vm1659_vm2, 0.0, %v1708_v60  ;;  %s802_s25 = scalar_lea.vmem %s6189_s2, %s6188_s10  ;;  %s3916_s10 = sshll.u32 %s4557_s21, 4 }
 0x10e   : > { %s6071_s1 = scalar_lea.hbm %s6159_s15, %s3916_s10 }
 0x10f   : > { %v1917_v2 = vsel %vm1837_vm3, %v1914_v53, %v1916_v55  ;;  %v1915_v3 = vsel %vm1837_vm3, %v1913_v58, %v1914_v53  ;;  %v5332_v37 = vsel %vm1659_vm2, %v1708_v60, %v1709_v62  ;;  %v1802_v19 = vsel %vm1659_vm2, %v1709_v62, 0.0  ;;  %v2943_v58 = vld [vmem:[%s6152_s8 + $0x40] sm:$0xff] }
 0x110   : > { %v2622_v31 = vrot.slane %v5332_v37, 1  ;;  %v2624_v42 = vrot.slane %v1802_v19, 1  ;;  %v2632_v53 = vrot.slane %v5335_v33, 2  ;;  %v2633_v55 = vrot.slane %v5332_v37, 2 }
 0x111   : > { %1121 = vrot.lane.b32.xlu1 %v1116_v63, %s6185_s22  ;;  %1119 = vrot.lane.b32.xlu0 %v1115_v15, %s6185_s22  ;;  %v1610_v63 = vmul.f32 0.0, %v1604_v43  ;;  %v1609_v15 = vmul.f32 0.0, %v1603_v49  ;;  %v2621_v43 = vrot.slane %v5335_v33, 1  ;;  %s3458_s22 = sshll.u32 %s755_s27, 4  ;;  %s6065_s22 = int_to_ptr.vmem [resolvable:$true] %s3458_s22 }
 0x112   : > { %v2625_v60 = vsel %vm1837_vm3, %v2622_v31, %v2624_v42 }
 0x113   : > { %v1661_v56 = vrot.slane %v1610_v63, 7  ;;  %v1660_v12 = vrot.slane %v1609_v15, 7  ;;  %v2623_v62 = vsel %vm1837_vm3, %v2621_v43, %v2622_v31 }
 0x115   : > { %1976 = vrot.lane.b32.xlu1 %v1912_v29, %s6186_s17  ;;  %1974 = vrot.lane.b32.xlu0 %v1910_v30, %s6186_s17  ;;  %v2092_v30 = vsel %vm2014_vm4, %v2090_v11, %v2091_v4  ;;  %v1786_v49 = vsel %vm1659_vm2, %v1661_v56, 0.0 }
 0x119   : > { %2153 = vrot.lane.b32.xlu1 %v2089_v1, %s6187_s24  ;;  %2151 = vrot.lane.b32.xlu0 %v2087_v51, %s6187_s24 }
 0x11b   : > { %v1925_v45 = vpop.permute.xlu1 %1924  ;;  %v1923_v35 = vpop.permute.xlu0 %1922 }
 0x11c   : > { %v2194_v25 = vsel %vm1137_vm1, %v4855_v23, %v1925_v45  ;;  %v2193_v6 = vsel %vm1137_vm1, %v4839_v7, %v1923_v35  ;;  %v5355_v23 = vsel %vm1659_vm2, 0.0, %v1660_v12  ;;  %v5360_v7 = vsel %vm1659_vm2, %v1660_v12, %v1661_v56 }
 0x11d   : > { %1980 = vrot.lane.b32.xlu1 %v1917_v2, %s6186_s17  ;;  %1978 = vrot.lane.b32.xlu0 %v1915_v3, %s6186_s17  ;;  %v1838_v63 = vrot.slane %v5355_v23, 1  ;;  %v1839_v15 = vrot.slane %v5360_v7, 1  ;;  %v2258_v2 = vld [vmem:[%s6152_s8 + $0x10] sm:$0xff]  ;;  %v1841_v35 = vrot.slane %v1786_v49, 1 }
 0x11e   : > { %4124 = vmatprep.subr.mxu0 %v2258_v2 }
 0x11f   : > { %v2102_v26 = vpop.permute.xlu1 %2101  ;;  %v2100_v29 = vpop.permute.xlu0 %2099  ;;  %4125 = vmatpush3.msra.mxu0 %v2258_v2  ;;  %v1840_v12 = vsel %vm1837_vm3, %v1838_v63, %v1839_v15 }
 0x120   : > { %v5348_v20 = vsel %vm2223_vm5, %v2194_v25, %v2102_v26  ;;  %v5351_v41 = vsel %vm2223_vm5, %v2193_v6, %v2100_v29  ;;  %v1842_v25 = vsel %vm1837_vm3, %v1839_v15, %v1841_v35  ;;  %v2016_v26 = vrot.slane %v5360_v7, 2 }
 0x121   : > { %2157 = vrot.lane.b32.xlu1 %v2094_v17, %s6187_s24  ;;  %2155 = vrot.lane.b32.xlu0 %v2092_v30, %s6187_s24  ;;  %v2634_v17 = vsel %vm2014_vm4, %v2632_v53, %v2633_v55  ;;  %v2015_v29 = vrot.slane %v5355_v23, 2 }
 0x122   : > { %4180 = vmatprep.mubr.msk.f32.mxu1 %vm2259_vm6, %v5351_v41 }
 0x123   : > { %4181 = vmatmul.mubr.msk.f32.vlgmr.msra.gmra.mrb[0].mxu1 %vm2259_vm6, %v5348_v20  ;;  %v1929_v1 = vpop.permute.xlu1 %1928  ;;  %v1927_v51 = vpop.permute.xlu0 %1926  ;;  %v2017_v53 = vsel %vm2014_vm4, %v2015_v29, %v2016_v26 }
 0x124   : > { %4293 = vmatpush3.bf16.msra.mxu1 %v5306_v28  ;;  %v2196_v3 = vsel %vm1137_vm1, %v4871_v39, %v1929_v1  ;;  %v2195_v4 = vsel %vm1137_vm1, %v4847_v13, %v1927_v51  ;;  %v2635_v28 = vrot.slane %v1802_v19, 2  ;;  %v2018_v19 = vrot.slane %v1786_v49, 2 }
 0x125   : > { %2628 = vrot.lane.b32.xlu1 %v2625_v60, %s6186_s17  ;;  %2626 = vrot.lane.b32.xlu0 %v2623_v62, %s6186_s17 }
 0x126   : > { %4232 = vmatprep.subr.mxu1 %v2943_v58  ;;  %v2636_v6 = vsel %vm2014_vm4, %v2633_v55, %v2635_v28  ;;  %v2019_v51 = vsel %vm2014_vm4, %v2016_v26, %v2018_v19 }
 0x127   : > { %v2106_v9 = vpop.permute.xlu1 %2105  ;;  %v2104_v45 = vpop.permute.xlu0 %2103 }
 0x128   : > { %v5387_v11 = vsel %vm2223_vm5, %v2196_v3, %v2106_v9  ;;  %v5390_v56 = vsel %vm2223_vm5, %v2195_v4, %v2104_v45  ;;  %4233 = vmatpush3.msra.mxu1 %v2943_v58 }
 0x129   : > { %1918 = vrot.lane.b32.xlu1 %v1840_v12, %s6186_s17  ;;  %2637 = vrot.lane.b32.xlu0 %v2634_v17, %s6187_s24 }
 0x12a   : > { %4183 = vmatprep.mubr.msk.f32.mxu1 %vm2259_vm6, %v5390_v56 }
 0x12b   : > { %4184 = vmatmul.mubr.msk.f32.gmra.mrb[2].mxu1 %vm2259_vm6, %v5387_v11  ;;  %v1933_v13 = vpop.permute.xlu1 %1932  ;;  %v1931_v39 = vpop.permute.xlu0 %1930 }
 0x12c   : > { %v2198_v30 = vsel %vm1137_vm1, %v4895_v0, %v1933_v13  ;;  %v2197_v31 = vsel %vm1137_vm1, %v4889_v57, %v1931_v39 }
 0x12d   : > { %1920 = vrot.lane.b32.xlu1 %v1842_v25, %s6186_s17  ;;  %2639 = vrot.lane.b32.xlu0 %v2636_v6, %s6187_s24 }
 0x12f   : > { %v2110_v42 = vpop.permute.xlu1 %2109  ;;  %v2108_v43 = vpop.permute.xlu0 %2107 }
 0x130   : > { %v5411_v49 = vsel %vm2223_vm5, %v2198_v30, %v2110_v42  ;;  %v5414_v1 = vsel %vm2223_vm5, %v2197_v31, %v2108_v43 }
 0x131   : > { %2097 = vrot.lane.b32.xlu1 %v2019_v51, %s6187_s24  ;;  %2095 = vrot.lane.b32.xlu0 %v2017_v53, %s6187_s24 }
 0x132   : > { %4186 = vmatprep.mubr.msk.f32.mxu1 %vm2259_vm6, %v5414_v1 }
 0x133   : > { %4187 = vmatmul.mubr.msk.f32.gmra.mrb[4].mxu1 %vm2259_vm6, %v5411_v49  ;;  %v1937_v57 = vpop.permute.xlu1 %1936  ;;  %v1935_v0 = vpop.permute.xlu0 %1934 }
 0x134   : > { %v2200_v55 = vsel %vm1137_vm1, %v4922_v27, %v1937_v57  ;;  %v2199_v58 = vsel %vm1137_vm1, %v4913_v18, %v1935_v0 }
 0x137   : > { %v2114_v60 = vpop.permute.xlu1 %2113  ;;  %v2112_v62 = vpop.permute.xlu0 %2111 }
 0x138   : > { %v5429_v63 = vsel %vm2223_vm5, %v2200_v55, %v2114_v60  ;;  %v5432_v15 = vsel %vm2223_vm5, %v2199_v58, %v2112_v62 }
 0x139   : > { %4189 = vmatprep.mubr.msk.f32.mxu1 %vm2259_vm6, %v5432_v15 }
 0x13a   : > { %4190 = vmatmul.mubr.msk.f32.gmra.mrb[6].mxu1 %vm2259_vm6, %v5429_v63 }
 0x13b   : > { %v1941_v2 = vpop.permute.xlu1 %1940  ;;  %v1939_v3 = vpop.permute.xlu0 %1938 }
 0x13c   : > { %v2202_v27 = vsel %vm1137_vm1, %v4955_v61, %v1941_v2  ;;  %v2201_v18 = vsel %vm1137_vm1, %v4949_v59, %v1939_v3 }
 0x13f   : > { %v2118_v4 = vpop.permute.xlu1 %2117  ;;  %v2116_v9 = vpop.permute.xlu0 %2115 }
 0x140   : > { %v5443_v45 = vsel %vm2223_vm5, %v2202_v27, %v2118_v4  ;;  %v5446_v35 = vsel %vm2223_vm5, %v2201_v18, %v2116_v9 }
 0x141   : > { %4192 = vmatprep.mubr.msk.f32.mxu1 %vm2259_vm6, %v5446_v35 }
 0x142   : > { %4193 = vmatmul.mubr.msk.f32.gmra.mrb[8].mxu1 %vm2259_vm6, %v5443_v45 }
 0x143   : > { %v1945_v28 = vpop.permute.xlu1 %1944  ;;  %v1943_v12 = vpop.permute.xlu0 %1942 }
 0x144   : > { %v2204_v61 = vsel %vm1137_vm1, %v4989_v36, %v1945_v28  ;;  %v2203_v59 = vsel %vm1137_vm1, %v4976_v24, %v1943_v12 }
 0x147   : > { %v2122_v17 = vpop.permute.xlu1 %2121  ;;  %v2120_v13 = vpop.permute.xlu0 %2119 }
 0x148   : > { %v5457_v39 = vsel %vm2223_vm5, %v2204_v61, %v2122_v17  ;;  %v5460_v19 = vsel %vm2223_vm5, %v2203_v59, %v2120_v13 }
 0x149   : > { %4195 = vmatprep.mubr.msk.f32.mxu1 %vm2259_vm6, %v5460_v19 }
 0x14a   : > { %4196 = vmatmul.mubr.msk.f32.gmra.mrb[10].mxu1 %vm2259_vm6, %v5457_v39 }
 0x14b   : > { %v1949_v25 = vpop.permute.xlu1 %1948  ;;  %v1947_v6 = vpop.permute.xlu0 %1946 }
 0x14c   : > { %v2206_v36 = vsel %vm1137_vm1, %v5016_v5, %v1949_v25  ;;  %v2205_v24 = vsel %vm1137_vm1, %v5023_v10, %v1947_v6 }
 0x14f   : > { %v2126_v26 = vpop.permute.xlu1 %2125  ;;  %v2124_v29 = vpop.permute.xlu0 %2123 }
 0x150   : > { %v5471_v30 = vsel %vm2223_vm5, %v2206_v36, %v2126_v26  ;;  %v5474_v31 = vsel %vm2223_vm5, %v2205_v24, %v2124_v29 }
 0x151   : > { %4198 = vmatprep.mubr.msk.f32.mxu1 %vm2259_vm6, %v5474_v31 }
 0x152   : > { %4199 = vmatmul.mubr.msk.f32.gmra.mrb[12].mxu1 %vm2259_vm6, %v5471_v30 }
 0x153   : > { %v1953_v42 = vpop.permute.xlu1 %1952  ;;  %v1951_v43 = vpop.permute.xlu0 %1950 }
 0x154   : > { %v2208_v5 = vsel %vm1137_vm1, %v5055_v46, %v1953_v42  ;;  %v2207_v10 = vsel %vm1137_vm1, %v5047_v38, %v1951_v43 }
 0x157   : > { %v2130_v51 = vpop.permute.xlu1 %2129  ;;  %v2128_v53 = vpop.permute.xlu0 %2127 }
 0x158   : > { %v5485_v57 = vsel %vm2223_vm5, %v2208_v5, %v2130_v51  ;;  %v5488_v0 = vsel %vm2223_vm5, %v2207_v10, %v2128_v53 }
 0x159   : > { %4201 = vmatprep.mubr.msk.f32.mxu1 %vm2259_vm6, %v5488_v0 }
 0x15a   : > { %4202 = vmatmul.mubr.msk.f32.gmra.mrb[14].mxu1 %vm2259_vm6, %v5485_v57 }
 0x15b   : > { %v1957_v55 = vpop.permute.xlu1 %1956  ;;  %v1955_v58 = vpop.permute.xlu0 %1954 }
 0x15c   : > { %v2210_v46 = vsel %vm1137_vm1, %v5098_v22, %v1957_v55  ;;  %v2209_v38 = vsel %vm1137_vm1, %v5091_v16, %v1955_v58 }
 0x15f   : > { %v2134_v60 = vpop.permute.xlu1 %2133  ;;  %v2132_v62 = vpop.permute.xlu0 %2131 }
 0x160   : > { %v5499_v2 = vsel %vm2223_vm5, %v2210_v46, %v2134_v60  ;;  %v5502_v3 = vsel %vm2223_vm5, %v2209_v38, %v2132_v62 }
 0x161   : > { %4204 = vmatprep.mubr.msk.f32.mxu1 %vm2259_vm6, %v5502_v3 }
 0x162   : > { %4205 = vmatmul.mubr.msk.f32.gmra.mrb[16].mxu1 %vm2259_vm6, %v5499_v2 }
 0x163   : > { %v1961_v27 = vpop.permute.xlu1 %1960  ;;  %v1959_v18 = vpop.permute.xlu0 %1958 }
 0x164   : > { %v2212_v22 = vsel %vm1137_vm1, %v5138_v8, %v1961_v27  ;;  %v2211_v16 = vsel %vm1137_vm1, %v5116_v52, %v1959_v18  ;;  %v5525_v52 = vld [vmem:[%s6155_s11] ss:$0 sm:$0xff] }
 0x167   : > { %v2138_v4 = vpop.permute.xlu1 %2137  ;;  %v2136_v9 = vpop.permute.xlu0 %2135 }
 0x168   : > { %v5513_v28 = vsel %vm2223_vm5, %v2212_v22, %v2138_v4  ;;  %v5516_v12 = vsel %vm2223_vm5, %v2211_v16, %v2136_v9 }
 0x169   : > { %4207 = vmatprep.mubr.msk.f32.mxu1 %vm2259_vm6, %v5516_v12 }
 0x16a   : > { %4208 = vmatmul.mubr.msk.f32.gmra.mrb[18].mxu1 %vm2259_vm6, %v5513_v28 }
 0x16b   : > { %v1965_v61 = vpop.permute.xlu1 %1964  ;;  %v1963_v8 = vpop.permute.xlu0 %1962 }
 0x16c   : > { %v2214_v59 = vsel %vm1137_vm1, %v5181_v48, %v1965_v61  ;;  %v2213_v17 = vsel %vm1137_vm1, %v5172_v40, %v1963_v8 }
 0x16f   : > { %v2142_v13 = vpop.permute.xlu1 %2141  ;;  %v2140_v25 = vpop.permute.xlu0 %2139 }
 0x170   : > { %v5532_v6 = vsel %vm2223_vm5, %v2214_v59, %v2142_v13  ;;  %v5535_v36 = vsel %vm2223_vm5, %v2213_v17, %v2140_v25  ;;  %v4074_v24 = vpop.f32.mrb[0].mxu0 }
 0x171   : > { %v1306_v48 = vadd.f32 %v4074_v24, %v5525_v52  ;;  %v1300_v26 = vpop.f32.mrb[1].mxu0  ;;  %4210 = vmatprep.mubr.msk.f32.mxu1 %vm2259_vm6, %v5535_v36 }
 0x172   : > { %v1301_v40 = vadd.f32 %v5525_v52, %v1300_v26  ;;  %4211 = vmatmul.mubr.msk.f32.gmra.mrb[20].mxu1 %vm2259_vm6, %v5532_v6 }
 0x173   : > { %1460 = vst.msk [vmem:[%s5541_s26 + $0x8] sm:$0xff] %vm1066_vm0, %v1306_v48  ;;  %v1969_v29 = vpop.permute.xlu1 %1968  ;;  %v1967_v42 = vpop.permute.xlu0 %1966  ;;  %v1114_v48 = vld [vmem:[%s802_s25 + $0x8] sm:$0xff] }
 0x174   : > { %1459 = vst.msk [vmem:[%s5541_s26] sm:$0xff] %vm1066_vm0, %v1301_v40  ;;  %v4077_v43 = vpop.f32.mrb[2].mxu0  ;;  %v2216_v53 = vsel %vm1137_vm1, %v5206_v21, %v1969_v29  ;;  %v2215_v55 = vsel %vm1137_vm1, %v5203_v14, %v1967_v42 }
 0x175   : > { %v1316_v5 = vadd.f32 %v4077_v43, %v5525_v52  ;;  %v1310_v10 = vpop.f32.mrb[3].mxu0  ;;  %v4453_v43 = vld [vmem:[%s6150_s6] ss:$0 sm:$0xff] }
 0x176   : > { %v1311_v51 = vadd.f32 %v5525_v52, %v1310_v10 }
 0x177   : > { %v2146_v58 = vpop.permute.xlu1 %2145  ;;  %v2144_v46 = vpop.permute.xlu0 %2143  ;;  %1462 = vst.msk [vmem:[%s5541_s26 + $0x18] sm:$0xff] %vm1066_vm0, %v1316_v5 }
 0x178   : > { %v5562_v38 = vsel %vm2223_vm5, %v2216_v53, %v2146_v58  ;;  %v5565_v60 = vsel %vm2223_vm5, %v2215_v55, %v2144_v46  ;;  %1461 = vst.msk [vmem:[%s5541_s26 + $0x10] sm:$0xff] %vm1066_vm0, %v1311_v51  ;;  %v4080_v62 = vpop.f32.mrb[4].mxu0  ;;  %v4454_v58 = vld [vmem:[%s6151_s7] ss:$0 sm:$0xff] }
 0x179   : > { %4213 = vmatprep.mubr.msk.f32.mxu1 %vm2259_vm6, %v5565_v60  ;;  %v1326_v14 = vadd.f32 %v4080_v62, %v5525_v52  ;;  %v1320_v21 = vpop.f32.mrb[5].mxu0 }
 0x17a   : > { %4214 = vmatmul.mubr.msk.f32.gmra.mrb[22].mxu1 %vm2259_vm6, %v5562_v38  ;;  %v1321_v27 = vadd.f32 %v5525_v52, %v1320_v21 }
 0x17b   : > { %v1973_v18 = vpop.permute.xlu1 %1972  ;;  %v1971_v22 = vpop.permute.xlu0 %1970  ;;  %1464 = vst.msk [vmem:[%s5541_s26 + $0x28] sm:$0xff] %vm1066_vm0, %v1326_v14 }
 0x17c   : > { %1463 = vst.msk [vmem:[%s5541_s26 + $0x20] sm:$0xff] %vm1066_vm0, %v1321_v27  ;;  %v2218_v61 = vsel %vm1137_vm1, %v5231_v54, %v1973_v18  ;;  %v2217_v8 = vsel %vm1137_vm1, %v5224_v47, %v1971_v22  ;;  %v1113_v54 = vld [vmem:[%s802_s25] sm:$0xff]  ;;  %s4570_s25 = smov [#allocation2]  }
 0x17d   : > { %v4083_v16 = vpop.f32.mrb[6].mxu0  ;;  %s4459_s2 = sshll.u32 %s4570_s25, 4  ;;  %s4460_s2 = int_to_ptr.vmem [resolvable:$false] %s4459_s2 }
 0x17e   : > { %v1336_v4 = vadd.f32 %v4083_v16, %v5525_v52  ;;  %v1330_v9 = vpop.f32.mrb[7].mxu0  ;;  %s4461_s4 = scalar_lea.vmem %s4460_s2, 32  ;;  %p4462_p1 = scmp.lt.s32.totalorder %s6065_s22, %s4460_s2 }
 0x17f   : > { %v2150_v59 = vpop.permute.xlu1 %2149  ;;  %v2148_v17 = vpop.permute.xlu0 %2147  ;;  %v1331_v13 = vadd.f32 %v5525_v52, %v1330_v9 }
 0x180   : > { %v5591_v25 = vsel %vm2223_vm5, %v2218_v61, %v2150_v59  ;;  %v5594_v24 = vsel %vm2223_vm5, %v2217_v8, %v2148_v17  ;;  %1466 = vst.msk [vmem:[%s5541_s26 + $0x38] sm:$0xff] %vm1066_vm0, %v1336_v4 }
 0x181   : > { %4216 = vmatprep.mubr.msk.f32.mxu1 %vm2259_vm6, %v5594_v24  ;;  %1465 = vst.msk [vmem:[%s5541_s26 + $0x30] sm:$0xff] %vm1066_vm0, %v1331_v13  ;;  %v4086_v42 = vpop.f32.mrb[8].mxu0 }
 0x182   : > { %4217 = vmatmul.mubr.msk.f32.gmra.mrb[24].mxu1 %vm2259_vm6, %v5591_v25  ;;  %v1346_v51 = vadd.f32 %v4086_v42, %v5525_v52  ;;  %v1340_v53 = vpop.f32.mrb[9].mxu0 }
 0x183   : > { %v1122_v47 = vpop.permute.xlu1 %1121  ;;  %v1120_v26 = vpop.permute.xlu0 %1119  ;;  %v1341_v55 = vadd.f32 %v5525_v52, %v1340_v53 }
 0x184   : > { %v1126_v40 = vsel %vm1066_vm0, %v1114_v48, %v1122_v47  ;;  %v1125_v29 = vsel %vm1066_vm0, %v1113_v54, %v1120_v26  ;;  %1468 = vst.msk [vmem:[%s5541_s26 + $0x48] sm:$0xff] %vm1066_vm0, %v1346_v51 }
 0x185   : > { %v1612_v5 = vmul.f32 %v4453_v43, %v1126_v40  ;;  %v1611_v10 = vmul.f32 %v4453_v43, %v1125_v29  ;;  %1467 = vst.msk [vmem:[%s5541_s26 + $0x40] sm:$0xff] %vm1066_vm0, %v1341_v55  ;;  %v4089_v22 = vpop.f32.mrb[10].mxu0 }
 0x186   : > { %v1356_v4 = vadd.f32 %v4089_v22, %v5525_v52  ;;  %v1350_v9 = vpop.f32.mrb[11].mxu0 }
 0x187   : > { %v1614_v46 = vadd.f32 %v4454_v58, %v1612_v5  ;;  %v1613_v62 = vadd.f32 %v4454_v58, %v1611_v10  ;;  %v1977_v14 = vpop.permute.xlu1 %1976  ;;  %v1975_v21 = vpop.permute.xlu0 %1974  ;;  %v1351_v48 = vadd.f32 %v5525_v52, %v1350_v9 }
 0x188   : > { %v2220_v16 = vsel %vm1137_vm1, %v5272_v50, %v1977_v14  ;;  %v2219_v59 = vsel %vm1137_vm1, %v5264_v44, %v1975_v21  ;;  %1470 = vst.msk [vmem:[%s5541_s26 + $0x58] sm:$0xff] %vm1066_vm0, %v1356_v4 }
 0x189   : > { %v1616_v27 = vmax.f32 %v1614_v46, 0.0  ;;  %v1615_v18 = vmax.f32 %v1613_v62, 0.0  ;;  %1469 = vst.msk [vmem:[%s5541_s26 + $0x50] sm:$0xff] %vm1066_vm0, %v1351_v48  ;;  %v4092_v44 = vpop.f32.mrb[12].mxu0 }
 0x18a   : > { %v1366_v40 = vadd.f32 %v4092_v44, %v5525_v52  ;;  %v1360_v29 = vpop.f32.mrb[13].mxu0 }
 0x18b   : > { %v1622_v61 = vmul.f32 0.0, %v1616_v27  ;;  %v1621_v8 = vmul.f32 0.0, %v1615_v18  ;;  %v2154_v17 = vpop.permute.xlu1 %2153  ;;  %v2152_v13 = vpop.permute.xlu0 %2151  ;;  %v1361_v53 = vadd.f32 %v5525_v52, %v1360_v29 }
 0x18c   : > { %v5625_v54 = vsel %vm2223_vm5, %v2220_v16, %v2154_v17  ;;  %v5628_v47 = vsel %vm2223_vm5, %v2219_v59, %v2152_v13  ;;  %1472 = vst.msk [vmem:[%s5541_s26 + $0x68] sm:$0xff] %vm1066_vm0, %v1366_v40 }
 0x18d   : > { %v1712_v50 = vrot.slane %v1622_v61, 7  ;;  %v1711_v26 = vrot.slane %v1621_v8, 7  ;;  %4219 = vmatprep.mubr.msk.f32.mxu1 %vm2259_vm6, %v5628_v47  ;;  %1471 = vst.msk [vmem:[%s5541_s26 + $0x60] sm:$0xff] %vm1066_vm0, %v1361_v53  ;;  %v4095_v8 = vpop.f32.mrb[14].mxu0 }
 0x18e   : > { %4220 = vmatmul.mubr.msk.f32.gmra.mrb[26].mxu1 %vm2259_vm6, %v5625_v54  ;;  %v1370_v59 = vpop.f32.mrb[15].mxu0 }
 0x18f   : > { %v1803_v42 = vsel %vm1659_vm2, %v1712_v50, 0.0  ;;  %v5641_v43 = vsel %vm1659_vm2, 0.0, %v1711_v26  ;;  %v1981_v5 = vpop.permute.xlu1 %1980  ;;  %v1979_v10 = vpop.permute.xlu0 %1978  ;;  %v5644_v51 = vsel %vm1659_vm2, %v1711_v26, %v1712_v50  ;;  %v1371_v13 = vadd.f32 %v5525_v52, %v1370_v59 }
 0x190   : > { %v2916_v55 = vrot.slane %v5644_v51, 1  ;;  %v2918_v58 = vrot.slane %v1803_v42, 1  ;;  %v2915_v46 = vrot.slane %v5641_v43, 1  ;;  %v2927_v14 = vrot.slane %v5644_v51, 2 }
 0x191   : > { %v2929_v21 = vrot.slane %v1803_v42, 2  ;;  %v2222_v27 = vsel %vm1137_vm1, %v5315_v34, %v1981_v5  ;;  %v2221_v18 = vsel %vm1137_vm1, %v5312_v32, %v1979_v10  ;;  %v2926_v9 = vrot.slane %v5641_v43, 2  ;;  %1473 = vst.msk [vmem:[%s5541_s26 + $0x70] sm:$0xff] %vm1066_vm0, %v1371_v13  ;;  %v4098_v44 = vpop.f32.mrb[16].mxu0 }
 0x192   : > { %v2919_v62 = vsel %vm1837_vm3, %v2916_v55, %v2918_v58  ;;  %v2917_v16 = vsel %vm1837_vm3, %v2915_v46, %v2916_v55  ;;  %v1376_v32 = vadd.f32 %v4095_v8, %v5525_v52  ;;  %v1386_v40 = vadd.f32 %v4098_v44, %v5525_v52  ;;  %v1380_v29 = vpop.f32.mrb[17].mxu0 }
 0x193   : > { %v2158_v22 = vpop.permute.xlu1 %2157  ;;  %2922 = vrot.lane.b32.xlu1 %v2919_v62, %s6186_s17  ;;  %v2156_v4 = vpop.permute.xlu0 %2155  ;;  %2920 = vrot.lane.b32.xlu0 %v2917_v16, %s6186_s17  ;;  %v2930_v17 = vsel %vm2014_vm4, %v2927_v14, %v2929_v21  ;;  %v2928_v50 = vsel %vm2014_vm4, %v2926_v9, %v2927_v14  ;;  %v1381_v53 = vadd.f32 %v5525_v52, %v1380_v29  ;;  %s6169_s17 = scalar_lea.vmem [#allocation4], %s6053_s29 }
 0x194   : > { %v5663_v61 = vsel %vm2223_vm5, %v2222_v27, %v2158_v22  ;;  %v5667_v34 = vsel %vm2223_vm5, %v2221_v18, %v2156_v4  ;;  %1474 = vst.msk [vmem:[%s5541_s26 + $0x78] sm:$0xff] %vm1066_vm0, %v1376_v32  ;;  %1476 = vst.msk [vmem:[%s5541_s26 + $0x88] sm:$0xff] %vm1066_vm0, %v1386_v40 }
 0x195   : > { %4222 = vmatprep.mubr.msk.f32.mxu1 %vm2259_vm6, %v5667_v34  ;;  %1475 = vst.msk [vmem:[%s5541_s26 + $0x80] sm:$0xff] %vm1066_vm0, %v1381_v53  ;;  %v4101_v14 = vpop.f32.mrb[18].mxu0 }
 0x196   : > { %4223 = vmatmul.mubr.msk.f32.gmra.mrb[28].mxu1 %vm2259_vm6, %v5663_v61  ;;  %v1396_v21 = vadd.f32 %v4101_v14, %v5525_v52  ;;  %v1390_v27 = vpop.f32.mrb[19].mxu0 }
 0x197   : > { %v2629_v48 = vpop.permute.xlu1 %2628  ;;  %2933 = vrot.lane.b32.xlu1 %v2930_v17, %s6187_s24  ;;  %v2627_v26 = vpop.permute.xlu0 %2626  ;;  %2931 = vrot.lane.b32.xlu0 %v2928_v50, %s6187_s24  ;;  %v1391_v18 = vadd.f32 %v5525_v52, %v1390_v27  ;;  %s3472_s24 = sshll.u32 %s6169_s17, 4  ;;  %s3433_s17 = scalar_lea.sflag [#allocation3], %s6053_s29  ;;  %s6073_s24 = int_to_ptr.vmem [resolvable:$true] %s3472_s24 }
 0x198   : > { %v2643_v42 = vsel %vm1137_vm1, %v5335_v33, %v2627_v26  ;;  %v2644_v58 = vsel %vm1137_vm1, %v5332_v37, %v2629_v48  ;;  %1478 = vst.msk [vmem:[%s5541_s26 + $0x98] sm:$0xff] %vm1066_vm0, %v1396_v21 }
 0x199   : > { %1477 = vst.msk [vmem:[%s5541_s26 + $0x90] sm:$0xff] %vm1066_vm0, %v1391_v18 }
 0x19b   : > { %v1919_v5 = vpop.permute.xlu1 %1918  ;;  %v2638_v10 = vpop.permute.xlu0 %2637 }
 0x19c   : > { %v5688_v55 = vsel %vm2223_vm5, %v2643_v42, %v2638_v10  ;;  %v2191_v37 = vsel %vm1137_vm1, %v5355_v23, %v1919_v5  ;;  %v4104_v23 = vpop.f32.mrb[20].mxu0 }
 0x19d   : > { %4225 = vmatprep.mubr.msk.f32.mxu1 %vm2259_vm6, %v5688_v55  ;;  %v1400_v32 = vpop.f32.mrb[21].mxu0 }
 0x19e   : > { %v1401_v59 = vadd.f32 %v5525_v52, %v1400_v32 }
 0x19f   : > { %v1921_v46 = vpop.permute.xlu1 %1920  ;;  %v2640_v33 = vpop.permute.xlu0 %2639 }
 0x1a0   : > { %v5699_v62 = vsel %vm2223_vm5, %v2644_v58, %v2640_v33  ;;  %v2192_v22 = vsel %vm1137_vm1, %v5360_v7, %v1921_v46  ;;  %v1406_v7 = vadd.f32 %v4104_v23, %v5525_v52  ;;  %1479 = vst.msk [vmem:[%s5541_s26 + $0xa0] sm:$0xff] %vm1066_vm0, %v1401_v59 }
 0x1a1   : > { %4226 = vmatmul.mubr.msk.f32.gmra.mrb[30].mxu1 %vm2259_vm6, %v5699_v62 }
 0x1a2   : > { %4234 = vmatprep.mubr.msk.f32.mxu1 %vm2259_vm6, %v5390_v56  ;;  %1480 = vst.msk [vmem:[%s5541_s26 + $0xa8] sm:$0xff] %vm1066_vm0, %v1406_v7 }
 0x1a3   : > { %v2098_v16 = vpop.permute.xlu1 %2097  ;;  %v2096_v4 = vpop.permute.xlu0 %2095 }
 0x1a4   : > { %v2225_v9 = vsel %vm2223_vm5, %v2192_v22, %v2098_v16  ;;  %v2224_v8 = vsel %vm2223_vm5, %v2191_v37, %v2096_v4 }
 0x1a5   : > { %4126 = vmatprep.mubr.msk.f32.mxu0 %vm2259_vm6, %v2224_v8  ;;  %4235 = vmatmul.mubr.msk.f32.vlgmr.msra.gmra.mrb[0].mxu1 %vm2259_vm6, %v5387_v11 }
 0x1a6   : > { %4127 = vmatmul.mubr.msk.f32.vlgmr.msra.gmra.mrb[32].mxu0 %vm2259_vm6, %v2225_v9  ;;  %4237 = vmatprep.mubr.msk.f32.mxu1 %vm2259_vm6, %v5414_v1 }
 0x1a7   : > { %4129 = vmatprep.mubr.msk.f32.mxu0 %vm2259_vm6, %v5351_v41  ;;  %v4107_v41 = vpop.f32.mrb[22].mxu0 }
 0x1a8   : > { %v1416_v17 = vadd.f32 %v4107_v41, %v5525_v52  ;;  %v1410_v13 = vpop.f32.mrb[23].mxu0 }
 0x1a9   : > { %4238 = vmatmul.mubr.msk.f32.gmra.mrb[2].mxu1 %vm2259_vm6, %v5411_v49  ;;  %v1411_v48 = vadd.f32 %v5525_v52, %v1410_v13 }
 0x1aa   : > { %4130 = vmatmul.mubr.msk.f32.gmra.mrb[34].mxu0 %vm2259_vm6, %v5348_v20  ;;  %4240 = vmatprep.mubr.msk.f32.mxu1 %vm2259_vm6, %v5432_v15  ;;  %1482 = vst.msk [vmem:[%s5541_s26 + $0xb8] sm:$0xff] %vm1066_vm0, %v1416_v17  ;;  %v4110_v20 = vpop.f32.mrb[24].mxu0 }
 0x1ab   : > { %4132 = vmatprep.mubr.msk.f32.mxu0 %vm2259_vm6, %v5390_v56  ;;  %1481 = vst.msk [vmem:[%s5541_s26 + $0xb0] sm:$0xff] %vm1066_vm0, %v1411_v48  ;;  %v1420_v56 = vpop.f32.mrb[25].mxu0 }
 0x1ad   : > { %4241 = vmatmul.mubr.msk.f32.gmra.mrb[4].mxu1 %vm2259_vm6, %v5429_v63 }
 0x1ae   : > { %4133 = vmatmul.mubr.msk.f32.gmra.mrb[36].mxu0 %vm2259_vm6, %v5387_v11  ;;  %4243 = vmatprep.mubr.msk.f32.mxu1 %vm2259_vm6, %v5446_v35  ;;  %v1426_v11 = vadd.f32 %v4110_v20, %v5525_v52 }
 0x1af   : > { %4135 = vmatprep.mubr.msk.f32.mxu0 %vm2259_vm6, %v5414_v1  ;;  %v1421_v1 = vadd.f32 %v5525_v52, %v1420_v56 }
 0x1b0   : > { %1484 = vst.msk [vmem:[%s5541_s26 + $0xc8] sm:$0xff] %vm1066_vm0, %v1426_v11 }
 0x1b1   : > { %4244 = vmatmul.mubr.msk.f32.gmra.mrb[6].mxu1 %vm2259_vm6, %v5443_v45  ;;  %1483 = vst.msk [vmem:[%s5541_s26 + $0xc0] sm:$0xff] %vm1066_vm0, %v1421_v1 }
 0x1b2   : > { %4136 = vmatmul.mubr.msk.f32.gmra.mrb[38].mxu0 %vm2259_vm6, %v5411_v49  ;;  %4246 = vmatprep.mubr.msk.f32.mxu1 %vm2259_vm6, %v5460_v19  ;;  %v4113_v49 = vpop.f32.mrb[26].mxu0 }
 0x1b3   : > { %4138 = vmatprep.mubr.msk.f32.mxu0 %vm2259_vm6, %v5432_v15  ;;  %v1430_v15 = vpop.f32.mrb[27].mxu0 }
 0x1b5   : > { %4247 = vmatmul.mubr.msk.f32.gmra.mrb[8].mxu1 %vm2259_vm6, %v5457_v39 }
 0x1b6   : > { %4139 = vmatmul.mubr.msk.f32.gmra.mrb[40].mxu0 %vm2259_vm6, %v5429_v63  ;;  %4249 = vmatprep.mubr.msk.f32.mxu1 %vm2259_vm6, %v5474_v31  ;;  %v1436_v63 = vadd.f32 %v4113_v49, %v5525_v52 }
 0x1b7   : > { %4141 = vmatprep.mubr.msk.f32.mxu0 %vm2259_vm6, %v5446_v35  ;;  %v1431_v35 = vadd.f32 %v5525_v52, %v1430_v15 }
 0x1b8   : > { %1486 = vst.msk [vmem:[%s5541_s26 + $0xd8] sm:$0xff] %vm1066_vm0, %v1436_v63 }
 0x1b9   : > { %4250 = vmatmul.mubr.msk.f32.gmra.mrb[10].mxu1 %vm2259_vm6, %v5471_v30  ;;  %1485 = vst.msk [vmem:[%s5541_s26 + $0xd0] sm:$0xff] %vm1066_vm0, %v1431_v35 }
 0x1ba   : > { %4142 = vmatmul.mubr.msk.f32.gmra.mrb[42].mxu0 %vm2259_vm6, %v5443_v45  ;;  %4252 = vmatprep.mubr.msk.f32.mxu1 %vm2259_vm6, %v5488_v0  ;;  %v4116_v45 = vpop.f32.mrb[28].mxu0 }
 0x1bb   : > { %4144 = vmatprep.mubr.msk.f32.mxu0 %vm2259_vm6, %v5460_v19  ;;  %v1446_v19 = vadd.f32 %v4116_v45, %v5525_v52  ;;  %v1440_v50 = vpop.f32.mrb[29].mxu0 }
 0x1bc   : > { %v1441_v26 = vadd.f32 %v5525_v52, %v1440_v50 }
 0x1bd   : > { %4253 = vmatmul.mubr.msk.f32.gmra.mrb[12].mxu1 %vm2259_vm6, %v5485_v57  ;;  %1488 = vst.msk [vmem:[%s5541_s26 + $0xe8] sm:$0xff] %vm1066_vm0, %v1446_v19 }
 0x1be   : > { %4145 = vmatmul.mubr.msk.f32.gmra.mrb[44].mxu0 %vm2259_vm6, %v5457_v39  ;;  %4255 = vmatprep.mubr.msk.f32.mxu1 %vm2259_vm6, %v5502_v3  ;;  %1487 = vst.msk [vmem:[%s5541_s26 + $0xe0] sm:$0xff] %vm1066_vm0, %v1441_v26  ;;  %v4119_v39 = vpop.f32.mrb[30].mxu0 }
 0x1bf   : > { %4147 = vmatprep.mubr.msk.f32.mxu0 %vm2259_vm6, %v5474_v31  ;;  %v1456_v31 = vadd.f32 %v4119_v39, %v5525_v52  ;;  %v1450_v44 = vpop.f32.mrb[31].mxu0 }
 0x1c0   : > { %v1451_v40 = vadd.f32 %v5525_v52, %v1450_v44 }
 0x1c1   : > { %4256 = vmatmul.mubr.msk.f32.gmra.mrb[14].mxu1 %vm2259_vm6, %v5499_v2  ;;  %1490 = vst.msk [vmem:[%s5541_s26 + $0xf8] sm:$0xff] %vm1066_vm0, %v1456_v31 }
 0x1c2   : > { %4148 = vmatmul.mubr.msk.f32.gmra.mrb[46].mxu0 %vm2259_vm6, %v5471_v30  ;;  %4258 = vmatprep.mubr.msk.f32.mxu1 %vm2259_vm6, %v5516_v12  ;;  %1489 = vst.msk [vmem:[%s5541_s26 + $0xf0] sm:$0xff] %vm1066_vm0, %v1451_v40  ;;  %s4455_s26 = scalar_lea.vmem %s6065_s22, 16 }
 0x1c3   : > { %4150 = vmatprep.mubr.msk.f32.mxu0 %vm2259_vm6, %v5488_v0  ;;  %p4456_p12 = scmp.ne.s32.totalorder %s6065_s22, %s4455_s26  ;;  %p4463_p2 = scmp.lt.s32.totalorder %s4461_s4, %s4455_s26 }
 0x1c5   : > { %4259 = vmatmul.mubr.msk.f32.gmra.mrb[16].mxu1 %vm2259_vm6, %v5513_v28  ;;  %p4457_p13 = pnand %p4456_p12, %p4692_p4  ;;  %p4464_p3 = por %p4463_p2, %p4462_p1 }
 0x1c6   : > { %4151 = vmatmul.mubr.msk.f32.gmra.mrb[48].mxu0 %vm2259_vm6, %v5485_v57  ;;  %4261 = vmatprep.mubr.msk.f32.mxu1 %vm2259_vm6, %v5535_v36 }
 0x1c7   : > { %4153 = vmatprep.mubr.msk.f32.mxu0 %vm2259_vm6, %v5502_v3  ;;  %p4458_p0 = pneg %p4457_p13 }
 0x1c9   : > { %4262 = vmatmul.mubr.msk.f32.gmra.mrb[18].mxu1 %vm2259_vm6, %v5532_v6  ;;  %p4465_p5 = pnand %p4464_p3, %p4458_p0 }
 0x1ca   : > { %4154 = vmatmul.mubr.msk.f32.gmra.mrb[50].mxu0 %vm2259_vm6, %v5499_v2  ;;  %4264 = vmatprep.mubr.msk.f32.mxu1 %vm2259_vm6, %v5565_v60 }
 0x1cb   : > { %4156 = vmatprep.mubr.msk.f32.mxu0 %vm2259_vm6, %v5516_v12 }
 0x1cd   : > { %4265 = vmatmul.mubr.msk.f32.gmra.mrb[20].mxu1 %vm2259_vm6, %v5562_v38 }
 0x1ce   : > { %4157 = vmatmul.mubr.msk.f32.gmra.mrb[52].mxu0 %vm2259_vm6, %v5513_v28  ;;  %4267 = vmatprep.mubr.msk.f32.mxu1 %vm2259_vm6, %v5594_v24 }
 0x1cf   : > { %4159 = vmatprep.mubr.msk.f32.mxu0 %vm2259_vm6, %v5535_v36 }
 0x1d1   : > { %4268 = vmatmul.mubr.msk.f32.gmra.mrb[22].mxu1 %vm2259_vm6, %v5591_v25 }
 0x1d2   : > { %4160 = vmatmul.mubr.msk.f32.gmra.mrb[54].mxu0 %vm2259_vm6, %v5532_v6  ;;  %4270 = vmatprep.mubr.msk.f32.mxu1 %vm2259_vm6, %v5628_v47  ;;  %v5884_v6 = vld [vmem:[%s6153_s9] ss:$0 sm:$0xff] }
 0x1d3   : > { %4162 = vmatprep.mubr.msk.f32.mxu0 %vm2259_vm6, %v5565_v60 }
 0x1d5   : > { %4271 = vmatmul.mubr.msk.f32.gmra.mrb[24].mxu1 %vm2259_vm6, %v5625_v54 }
 0x1d6   : > { %4163 = vmatmul.mubr.msk.f32.gmra.mrb[56].mxu0 %vm2259_vm6, %v5562_v38  ;;  %4273 = vmatprep.mubr.msk.f32.mxu1 %vm2259_vm6, %v5667_v34 }
 0x1d7   : > { %4165 = vmatprep.mubr.msk.f32.mxu0 %vm2259_vm6, %v5594_v24 }
 0x1d9   : > { %4274 = vmatmul.mubr.msk.f32.gmra.mrb[26].mxu1 %vm2259_vm6, %v5663_v61 }
 0x1da   : > { %4166 = vmatmul.mubr.msk.f32.gmra.mrb[58].mxu0 %vm2259_vm6, %v5591_v25  ;;  %4276 = vmatprep.mubr.msk.f32.mxu1 %vm2259_vm6, %v5688_v55 }
 0x1db   : > { %4168 = vmatprep.mubr.msk.f32.mxu0 %vm2259_vm6, %v5628_v47 }
 0x1dd   : > { %4277 = vmatmul.mubr.msk.f32.gmra.mrb[28].mxu1 %vm2259_vm6, %v5699_v62 }
 0x1de   : > { %4169 = vmatmul.mubr.msk.f32.gmra.mrb[60].mxu0 %vm2259_vm6, %v5625_v54 }
 0x1df   : > { %4171 = vmatprep.mubr.msk.f32.mxu0 %vm2259_vm6, %v5667_v34 }
 0x1e2   : > { %4172 = vmatmul.mubr.msk.f32.gmra.mrb[62].mxu0 %vm2259_vm6, %v5663_v61 }
 0x205   : > { %v2923_v30 = vpop.permute.xlu1 %2922  ;;  %v2921_v57 = vpop.permute.xlu0 %2920 }
 0x206   : > { %v2938_v0 = vsel %vm1137_vm1, %v5644_v51, %v2923_v30  ;;  %v2937_v3 = vsel %vm1137_vm1, %v5641_v43, %v2921_v57 }
 0x209   : > { %v2934_v2 = vpop.permute.xlu1 %2933  ;;  %v2932_v12 = vpop.permute.xlu0 %2931 }
 0x20a   : > { %v2940_v28 = vsel %vm2223_vm5, %v2938_v0, %v2934_v2  ;;  %v2939_v52 = vsel %vm2223_vm5, %v2937_v3, %v2932_v12 }
 0x20b   : > { %4279 = vmatprep.mubr.msk.f32.mxu1 %vm2259_vm6, %v2939_v52 }
 0x20c   : > { %4280 = vmatmul.mubr.msk.f32.gmra.mrb[30].mxu1 %vm2259_vm6, %v2940_v28 }
 0x278   : > { %v4236_v36 = vpop.f32.mrb[0].mxu1 }
 0x279   : > { %v4128_v38 = vpop.f32.mrb[32].mxu0  ;;  %v3016_v60 = vpop.f32.mrb[1].mxu1 }
 0x27a   : > { %v2588_v25 = vadd.f32 %v4128_v38, %v5884_v6  ;;  %v2422_v24 = vpop.f32.mrb[33].mxu0 }
 0x27b   : > { %v2587_v54 = vadd.f32 %v5884_v6, %v2422_v24 }
 0x27c   : > { %v4295_v47 = vadd.f32 %v4236_v36, %v2588_v25  ;;  %v4239_v43 = vpop.f32.mrb[2].mxu1 }
 0x27d   : > { %v4297_v51 = vadd.f32 %v3016_v60, %v2587_v54  ;;  %v4131_v61 = vpop.f32.mrb[34].mxu0  ;;  %v3026_v34 = vpop.f32.mrb[3].mxu1 }
 0x27e   : > { %3208 = vst.msk [vmem:[%s5891_s3 + $0x8] sm:$0xff] %vm1066_vm0, %v4295_v47  ;;  %v3240_v29 = vsel %vm1066_vm0, %v4295_v47, 0.0  ;;  %v3311_v42 = vmul.f32 %v4295_v47, %v4295_v47  ;;  %v2590_v5 = vadd.f32 %v4131_v61, %v5884_v6  ;;  %v2432_v10 = vpop.f32.mrb[35].mxu0 }
 0x27f   : > { %3207 = vst.msk [vmem:[%s5891_s3] sm:$0xff] %vm1066_vm0, %v4297_v51  ;;  %v3239_v53 = vsel %vm1066_vm0, %v4297_v51, 0.0  ;;  %v3310_v55 = vmul.f32 %v4297_v51, %v4297_v51  ;;  %v2589_v58 = vadd.f32 %v5884_v6, %v2432_v10 }
 0x280   : > { %v3343_v46 = vsel %vm1066_vm0, %v3311_v42, 0.0  ;;  %v3241_v33 = vadd.f32 %v3240_v29, %v3239_v53  ;;  %v4299_v62 = vadd.f32 %v4239_v43, %v2590_v5  ;;  %v4242_v14 = vpop.f32.mrb[4].mxu1 }
 0x281   : > { %v3342_v21 = vsel %vm1066_vm0, %v3310_v55, 0.0  ;;  %v4301_v27 = vadd.f32 %v3026_v34, %v2589_v58  ;;  %v4134_v18 = vpop.f32.mrb[36].mxu0  ;;  %v3036_v37 = vpop.f32.mrb[5].mxu1 }
 0x282   : > { %v3344_v22 = vadd.f32 %v3343_v46, %v3342_v21  ;;  %3210 = vst.msk [vmem:[%s5891_s3 + $0x18] sm:$0xff] %vm1066_vm0, %v4299_v62  ;;  %v3313_v16 = vmul.f32 %v4299_v62, %v4299_v62  ;;  %v2592_v4 = vadd.f32 %v4134_v18, %v5884_v6  ;;  %v2442_v9 = vpop.f32.mrb[37].mxu0  ;;  %v3244_v17 = vsel %vm1066_vm0, %v4299_v62, 0.0 }
 0x283   : > { %3209 = vst.msk [vmem:[%s5891_s3 + $0x10] sm:$0xff] %vm1066_vm0, %v4301_v27  ;;  %v3242_v8 = vsel %vm1066_vm0, %v4301_v27, 0.0  ;;  %v3312_v23 = vmul.f32 %v4301_v27, %v4301_v27  ;;  %v2591_v7 = vadd.f32 %v5884_v6, %v2442_v9 }
 0x284   : > { %v3243_v32 = vadd.f32 %v3242_v8, %v3241_v33  ;;  %v4303_v59 = vadd.f32 %v4242_v14, %v2592_v4  ;;  %v4245_v41 = vpop.f32.mrb[6].mxu1  ;;  %v3347_v56 = vsel %vm1066_vm0, %v3313_v16, 0.0 }
 0x285   : > { %v3345_v13 = vsel %vm1066_vm0, %v3312_v23, 0.0  ;;  %v4305_v48 = vadd.f32 %v3036_v37, %v2591_v7  ;;  %v4137_v20 = vpop.f32.mrb[38].mxu0  ;;  %v3046_v11 = vpop.f32.mrb[7].mxu1 }
 0x286   : > { %v3346_v1 = vadd.f32 %v3345_v13, %v3344_v22  ;;  %3212 = vst.msk [vmem:[%s5891_s3 + $0x28] sm:$0xff] %vm1066_vm0, %v4303_v59  ;;  %v3315_v49 = vmul.f32 %v4303_v59, %v4303_v59  ;;  %v3245_v63 = vadd.f32 %v3244_v17, %v3243_v32  ;;  %v2452_v15 = vpop.f32.mrb[39].mxu0  ;;  %v2594_v19 = vadd.f32 %v4137_v20, %v5884_v6 }
 0x287   : > { %3211 = vst.msk [vmem:[%s5891_s3 + $0x20] sm:$0xff] %vm1066_vm0, %v4305_v48  ;;  %v3246_v35 = vsel %vm1066_vm0, %v4305_v48, 0.0  ;;  %v3314_v45 = vmul.f32 %v4305_v48, %v4305_v48  ;;  %v2593_v50 = vadd.f32 %v5884_v6, %v2452_v15  ;;  %v3248_v44 = vsel %vm1066_vm0, %v4303_v59, 0.0 }
 0x288   : > { %v3247_v26 = vadd.f32 %v3246_v35, %v3245_v63  ;;  %v3348_v39 = vadd.f32 %v3347_v56, %v3346_v1  ;;  %v4248_v31 = vpop.f32.mrb[8].mxu1  ;;  %v4307_v30 = vadd.f32 %v4245_v41, %v2594_v19  ;;  %v3351_v36 = vsel %vm1066_vm0, %v3315_v49, 0.0 }
 0x289   : > { %v3349_v40 = vsel %vm1066_vm0, %v3314_v45, 0.0  ;;  %v4309_v57 = vadd.f32 %v3046_v11, %v2593_v50  ;;  %v4140_v0 = vpop.f32.mrb[40].mxu0  ;;  %v3056_v2 = vpop.f32.mrb[9].mxu1 }
 0x28a   : > { %v3350_v3 = vadd.f32 %v3349_v40, %v3348_v39  ;;  %v3249_v28 = vadd.f32 %v3248_v44, %v3247_v26  ;;  %v2596_v12 = vadd.f32 %v4140_v0, %v5884_v6  ;;  %v2462_v52 = vpop.f32.mrb[41].mxu0  ;;  %3214 = vst.msk [vmem:[%s5891_s3 + $0x38] sm:$0xff] %vm1066_vm0, %v4307_v30  ;;  %v3317_v38 = vmul.f32 %v4307_v30, %v4307_v30 }
 0x28b   : > { %3213 = vst.msk [vmem:[%s5891_s3 + $0x30] sm:$0xff] %vm1066_vm0, %v4309_v57  ;;  %v3250_v60 = vsel %vm1066_vm0, %v4309_v57, 0.0  ;;  %v3316_v25 = vmul.f32 %v4309_v57, %v4309_v57  ;;  %v2595_v43 = vadd.f32 %v5884_v6, %v2462_v52  ;;  %v3252_v42 = vsel %vm1066_vm0, %v4307_v30, 0.0 }
 0x28c   : > { %v3251_v24 = vadd.f32 %v3250_v60, %v3249_v28  ;;  %v3352_v54 = vadd.f32 %v3351_v36, %v3350_v3  ;;  %v4311_v47 = vadd.f32 %v4248_v31, %v2596_v12  ;;  %v4251_v51 = vpop.f32.mrb[10].mxu1  ;;  %v3355_v5 = vsel %vm1066_vm0, %v3317_v38, 0.0 }
 0x28d   : > { %v3353_v61 = vsel %vm1066_vm0, %v3316_v25, 0.0  ;;  %v4143_v34 = vpop.f32.mrb[42].mxu0  ;;  %v3066_v29 = vpop.f32.mrb[11].mxu1  ;;  %v4313_v53 = vadd.f32 %v3056_v2, %v2595_v43 }
 0x28e   : > { %v3354_v10 = vadd.f32 %v3353_v61, %v3352_v54  ;;  %3216 = vst.msk [vmem:[%s5891_s3 + $0x48] sm:$0xff] %vm1066_vm0, %v4311_v47  ;;  %v2472_v55 = vpop.f32.mrb[43].mxu0  ;;  %v3319_v58 = vmul.f32 %v4311_v47, %v4311_v47  ;;  %v3253_v46 = vadd.f32 %v3252_v42, %v3251_v24  ;;  %v2598_v33 = vadd.f32 %v4143_v34, %v5884_v6 }
 0x28f   : > { %v2597_v62 = vadd.f32 %v5884_v6, %v2472_v55  ;;  %3215 = vst.msk [vmem:[%s5891_s3 + $0x40] sm:$0xff] %vm1066_vm0, %v4313_v53  ;;  %v3254_v14 = vsel %vm1066_vm0, %v4313_v53, 0.0  ;;  %v3318_v21 = vmul.f32 %v4313_v53, %v4313_v53  ;;  %v3256_v8 = vsel %vm1066_vm0, %v4311_v47, 0.0 }
 0x290   : > { %v3356_v27 = vadd.f32 %v3355_v5, %v3354_v10  ;;  %v4254_v18 = vpop.f32.mrb[12].mxu1  ;;  %v3255_v37 = vadd.f32 %v3254_v14, %v3253_v46  ;;  %v4315_v22 = vadd.f32 %v4251_v51, %v2598_v33  ;;  %v3359_v59 = vsel %vm1066_vm0, %v3319_v58, 0.0 }
 0x291   : > { %v4317_v16 = vadd.f32 %v3066_v29, %v2597_v62  ;;  %v4146_v4 = vpop.f32.mrb[44].mxu0  ;;  %v3076_v9 = vpop.f32.mrb[13].mxu1  ;;  %v3357_v23 = vsel %vm1066_vm0, %v3318_v21, 0.0 }
 0x292   : > { %v2600_v7 = vadd.f32 %v4146_v4, %v5884_v6  ;;  %v2482_v32 = vpop.f32.mrb[45].mxu0  ;;  %v3358_v41 = vadd.f32 %v3357_v23, %v3356_v27  ;;  %3218 = vst.msk [vmem:[%s5891_s3 + $0x58] sm:$0xff] %vm1066_vm0, %v4315_v22  ;;  %v3321_v17 = vmul.f32 %v4315_v22, %v4315_v22  ;;  %v3257_v13 = vadd.f32 %v3256_v8, %v3255_v37 }
 0x293   : > { %3217 = vst.msk [vmem:[%s5891_s3 + $0x50] sm:$0xff] %vm1066_vm0, %v4317_v16  ;;  %v3258_v48 = vsel %vm1066_vm0, %v4317_v16, 0.0  ;;  %v3320_v20 = vmul.f32 %v4317_v16, %v4317_v16  ;;  %v2599_v56 = vadd.f32 %v5884_v6, %v2482_v32  ;;  %v3260_v45 = vsel %vm1066_vm0, %v4315_v22, 0.0 }
 0x294   : > { %v4319_v11 = vadd.f32 %v4254_v18, %v2600_v7  ;;  %v4257_v1 = vpop.f32.mrb[14].mxu1  ;;  %v3259_v49 = vadd.f32 %v3258_v48, %v3257_v13  ;;  %v3360_v63 = vadd.f32 %v3359_v59, %v3358_v41  ;;  %v3363_v57 = vsel %vm1066_vm0, %v3321_v17, 0.0 }
 0x295   : > { %v4149_v15 = vpop.f32.mrb[46].mxu0  ;;  %v3086_v35 = vpop.f32.mrb[15].mxu1  ;;  %v3361_v19 = vsel %vm1066_vm0, %v3320_v20, 0.0  ;;  %v4321_v26 = vadd.f32 %v3076_v9, %v2599_v56 }
 0x296   : > { %3220 = vst.msk [vmem:[%s5891_s3 + $0x68] sm:$0xff] %vm1066_vm0, %v4319_v11  ;;  %v3323_v50 = vmul.f32 %v4319_v11, %v4319_v11  ;;  %v2492_v39 = vpop.f32.mrb[47].mxu0  ;;  %v3362_v31 = vadd.f32 %v3361_v19, %v3360_v63  ;;  %v3261_v44 = vadd.f32 %v3260_v45, %v3259_v49  ;;  %v2602_v40 = vadd.f32 %v4149_v15, %v5884_v6 }
 0x297   : > { %v2601_v30 = vadd.f32 %v5884_v6, %v2492_v39  ;;  %3219 = vst.msk [vmem:[%s5891_s3 + $0x60] sm:$0xff] %vm1066_vm0, %v4321_v26  ;;  %v3262_v0 = vsel %vm1066_vm0, %v4321_v26, 0.0  ;;  %v3322_v2 = vmul.f32 %v4321_v26, %v4321_v26  ;;  %v3264_v25 = vsel %vm1066_vm0, %v4319_v11, 0.0 }
 0x298   : > { %v4260_v3 = vpop.f32.mrb[16].mxu1  ;;  %v3263_v28 = vadd.f32 %v3262_v0, %v3261_v44  ;;  %v3364_v12 = vadd.f32 %v3363_v57, %v3362_v31  ;;  %v4323_v52 = vadd.f32 %v4257_v1, %v2602_v40  ;;  %v3367_v43 = vsel %vm1066_vm0, %v3323_v50, 0.0 }
 0x299   : > { %v4325_v36 = vadd.f32 %v3086_v35, %v2601_v30  ;;  %v4152_v38 = vpop.f32.mrb[48].mxu0  ;;  %v3096_v60 = vpop.f32.mrb[17].mxu1  ;;  %v3365_v24 = vsel %vm1066_vm0, %v3322_v2, 0.0 }
 0x29a   : > { %v2604_v54 = vadd.f32 %v4152_v38, %v5884_v6  ;;  %v2502_v47 = vpop.f32.mrb[49].mxu0  ;;  %v3366_v51 = vadd.f32 %v3365_v24, %v3364_v12  ;;  %3222 = vst.msk [vmem:[%s5891_s3 + $0x78] sm:$0xff] %vm1066_vm0, %v4323_v52  ;;  %v3325_v61 = vmul.f32 %v4323_v52, %v4323_v52  ;;  %v3265_v34 = vadd.f32 %v3264_v25, %v3263_v28 }
 0x29b   : > { %3221 = vst.msk [vmem:[%s5891_s3 + $0x70] sm:$0xff] %vm1066_vm0, %v4325_v36  ;;  %v3266_v29 = vsel %vm1066_vm0, %v4325_v36, 0.0  ;;  %v3324_v42 = vmul.f32 %v4325_v36, %v4325_v36  ;;  %v2603_v10 = vadd.f32 %v5884_v6, %v2502_v47  ;;  %v3268_v62 = vsel %vm1066_vm0, %v4323_v52, 0.0 }
 0x29c   : > { %v4327_v5 = vadd.f32 %v4260_v3, %v2604_v54  ;;  %v4263_v53 = vpop.f32.mrb[18].mxu1  ;;  %v3267_v55 = vadd.f32 %v3266_v29, %v3265_v34  ;;  %v3368_v58 = vadd.f32 %v3367_v43, %v3366_v51  ;;  %v3371_v9 = vsel %vm1066_vm0, %v3325_v61, 0.0 }
 0x29d   : > { %v4155_v46 = vpop.f32.mrb[50].mxu0  ;;  %v3106_v33 = vpop.f32.mrb[19].mxu1  ;;  %v3369_v14 = vsel %vm1066_vm0, %v3324_v42, 0.0  ;;  %v4329_v27 = vadd.f32 %v3096_v60, %v2603_v10 }
 0x29e   : > { %3224 = vst.msk [vmem:[%s5891_s3 + $0x88] sm:$0xff] %vm1066_vm0, %v4327_v5  ;;  %v3327_v21 = vmul.f32 %v4327_v5, %v4327_v5  ;;  %v2512_v18 = vpop.f32.mrb[51].mxu0  ;;  %v3370_v37 = vadd.f32 %v3369_v14, %v3368_v58  ;;  %v3269_v22 = vadd.f32 %v3268_v62, %v3267_v55  ;;  %v2606_v16 = vadd.f32 %v4155_v46, %v5884_v6 }
 0x29f   : > { %v2605_v4 = vadd.f32 %v5884_v6, %v2512_v18  ;;  %3223 = vst.msk [vmem:[%s5891_s3 + $0x80] sm:$0xff] %vm1066_vm0, %v4329_v27  ;;  %v3270_v8 = vsel %vm1066_vm0, %v4329_v27, 0.0  ;;  %v3326_v23 = vmul.f32 %v4329_v27, %v4329_v27  ;;  %v3272_v20 = vsel %vm1066_vm0, %v4327_v5, 0.0 }
 0x2a0   : > { %v4266_v7 = vpop.f32.mrb[20].mxu1  ;;  %v3271_v32 = vadd.f32 %v3270_v8, %v3269_v22  ;;  %v3372_v59 = vadd.f32 %v3371_v9, %v3370_v37  ;;  %v4331_v41 = vadd.f32 %v4263_v53, %v2606_v16  ;;  %v3375_v49 = vsel %vm1066_vm0, %v3327_v21, 0.0 }
 0x2a1   : > { %v4333_v17 = vadd.f32 %v3106_v33, %v2605_v4  ;;  %v4158_v13 = vpop.f32.mrb[52].mxu0  ;;  %v3116_v48 = vpop.f32.mrb[21].mxu1  ;;  %v3373_v11 = vsel %vm1066_vm0, %v3326_v23, 0.0 }
 0x2a2   : > { %v2608_v56 = vadd.f32 %v4158_v13, %v5884_v6  ;;  %v2522_v1 = vpop.f32.mrb[53].mxu0  ;;  %v3374_v63 = vadd.f32 %v3373_v11, %v3372_v59  ;;  %3226 = vst.msk [vmem:[%s5891_s3 + $0x98] sm:$0xff] %vm1066_vm0, %v4331_v41  ;;  %v3329_v15 = vmul.f32 %v4331_v41, %v4331_v41  ;;  %v3273_v35 = vadd.f32 %v3272_v20, %v3271_v32 }
 0x2a3   : > { %3225 = vst.msk [vmem:[%s5891_s3 + $0x90] sm:$0xff] %vm1066_vm0, %v4333_v17  ;;  %v3274_v45 = vsel %vm1066_vm0, %v4333_v17, 0.0  ;;  %v3328_v19 = vmul.f32 %v4333_v17, %v4333_v17  ;;  %v2607_v26 = vadd.f32 %v5884_v6, %v2522_v1  ;;  %v3276_v57 = vsel %vm1066_vm0, %v4331_v41, 0.0 }
 0x2a4   : > { %v4335_v50 = vadd.f32 %v4266_v7, %v2608_v56  ;;  %v4269_v39 = vpop.f32.mrb[22].mxu1  ;;  %v3275_v31 = vadd.f32 %v3274_v45, %v3273_v35  ;;  %v3376_v44 = vadd.f32 %v3375_v49, %v3374_v63  ;;  %v3379_v60 = vsel %vm1066_vm0, %v3329_v15, 0.0 }
 0x2a5   : > { %v4161_v40 = vpop.f32.mrb[54].mxu0  ;;  %v3126_v30 = vpop.f32.mrb[23].mxu1  ;;  %v3377_v0 = vsel %vm1066_vm0, %v3328_v19, 0.0  ;;  %v4337_v3 = vadd.f32 %v3116_v48, %v2607_v26 }
 0x2a6   : > { %3228 = vst.msk [vmem:[%s5891_s3 + $0xa8] sm:$0xff] %vm1066_vm0, %v4335_v50  ;;  %v3331_v2 = vmul.f32 %v4335_v50, %v4335_v50  ;;  %v2532_v28 = vpop.f32.mrb[55].mxu0  ;;  %v3378_v12 = vadd.f32 %v3377_v0, %v3376_v44  ;;  %v3277_v52 = vadd.f32 %v3276_v57, %v3275_v31  ;;  %v2610_v36 = vadd.f32 %v4161_v40, %v5884_v6 }
 0x2a7   : > { %v2609_v38 = vadd.f32 %v5884_v6, %v2532_v28  ;;  %3227 = vst.msk [vmem:[%s5891_s3 + $0xa0] sm:$0xff] %vm1066_vm0, %v4337_v3  ;;  %v3278_v25 = vsel %vm1066_vm0, %v4337_v3, 0.0  ;;  %v3330_v24 = vmul.f32 %v4337_v3, %v4337_v3  ;;  %v3280_v42 = vsel %vm1066_vm0, %v4335_v50, 0.0 }
 0x2a8   : > { %v4272_v54 = vpop.f32.mrb[24].mxu1  ;;  %v3279_v47 = vadd.f32 %v3278_v25, %v3277_v52  ;;  %v3380_v43 = vadd.f32 %v3379_v60, %v3378_v12  ;;  %v4339_v51 = vadd.f32 %v4269_v39, %v2610_v36  ;;  %v3383_v55 = vsel %vm1066_vm0, %v3331_v2, 0.0 }
 0x2a9   : > { %v4341_v61 = vadd.f32 %v3126_v30, %v2609_v38  ;;  %v4164_v34 = vpop.f32.mrb[56].mxu0  ;;  %v3136_v29 = vpop.f32.mrb[25].mxu1  ;;  %v3381_v5 = vsel %vm1066_vm0, %v3330_v24, 0.0 }
 0x2aa   : > { %v2612_v10 = vadd.f32 %v4164_v34, %v5884_v6  ;;  %v2542_v53 = vpop.f32.mrb[57].mxu0  ;;  %v3382_v58 = vadd.f32 %v3381_v5, %v3380_v43  ;;  %3230 = vst.msk [vmem:[%s5891_s3 + $0xb8] sm:$0xff] %vm1066_vm0, %v4339_v51  ;;  %v3333_v46 = vmul.f32 %v4339_v51, %v4339_v51  ;;  %v3281_v33 = vadd.f32 %v3280_v42, %v3279_v47 }
 0x2ab   : > { %3229 = vst.msk [vmem:[%s5891_s3 + $0xb0] sm:$0xff] %vm1066_vm0, %v4341_v61  ;;  %v3282_v62 = vsel %vm1066_vm0, %v4341_v61, 0.0  ;;  %v3332_v14 = vmul.f32 %v4341_v61, %v4341_v61  ;;  %v2611_v27 = vadd.f32 %v5884_v6, %v2542_v53  ;;  %v3284_v9 = vsel %vm1066_vm0, %v4339_v51, 0.0 }
 0x2ac   : > { %v4343_v21 = vadd.f32 %v4272_v54, %v2612_v10  ;;  %v4275_v18 = vpop.f32.mrb[26].mxu1  ;;  %v3283_v37 = vadd.f32 %v3282_v62, %v3281_v33  ;;  %v3384_v22 = vadd.f32 %v3383_v55, %v3382_v58  ;;  %v3387_v48 = vsel %vm1066_vm0, %v3333_v46, 0.0 }
 0x2ad   : > { %v4167_v16 = vpop.f32.mrb[58].mxu0  ;;  %v3146_v4 = vpop.f32.mrb[27].mxu1  ;;  %v3385_v8 = vsel %vm1066_vm0, %v3332_v14, 0.0  ;;  %v4345_v7 = vadd.f32 %v3136_v29, %v2611_v27 }
 0x2ae   : > { %3232 = vst.msk [vmem:[%s5891_s3 + $0xc8] sm:$0xff] %vm1066_vm0, %v4343_v21  ;;  %v3335_v23 = vmul.f32 %v4343_v21, %v4343_v21  ;;  %v2552_v32 = vpop.f32.mrb[59].mxu0  ;;  %v3386_v59 = vadd.f32 %v3385_v8, %v3384_v22  ;;  %v3285_v41 = vadd.f32 %v3284_v9, %v3283_v37  ;;  %v2614_v17 = vadd.f32 %v4167_v16, %v5884_v6 }
 0x2af   : > { %v2613_v13 = vadd.f32 %v5884_v6, %v2552_v32  ;;  %3231 = vst.msk [vmem:[%s5891_s3 + $0xc0] sm:$0xff] %vm1066_vm0, %v4345_v7  ;;  %v3286_v20 = vsel %vm1066_vm0, %v4345_v7, 0.0  ;;  %v3334_v11 = vmul.f32 %v4345_v7, %v4345_v7  ;;  %v3288_v19 = vsel %vm1066_vm0, %v4343_v21, 0.0 }
 0x2b0   : > { %v4278_v56 = vpop.f32.mrb[28].mxu1  ;;  %v3287_v1 = vadd.f32 %v3286_v20, %v3285_v41  ;;  %v3388_v49 = vadd.f32 %v3387_v48, %v3386_v59  ;;  %v4347_v63 = vadd.f32 %v4275_v18, %v2614_v17  ;;  %v3391_v31 = vsel %vm1066_vm0, %v3335_v23, 0.0 }
 0x2b1   : > { %v4349_v15 = vadd.f32 %v3146_v4, %v2613_v13  ;;  %v4170_v35 = vpop.f32.mrb[60].mxu0  ;;  %v3156_v45 = vpop.f32.mrb[29].mxu1  ;;  %v3389_v50 = vsel %vm1066_vm0, %v3334_v11, 0.0 }
 0x2b2   : > { %v2616_v26 = vadd.f32 %v4170_v35, %v5884_v6  ;;  %v2562_v39 = vpop.f32.mrb[61].mxu0  ;;  %v3390_v44 = vadd.f32 %v3389_v50, %v3388_v49  ;;  %3234 = vst.msk [vmem:[%s5891_s3 + $0xd8] sm:$0xff] %vm1066_vm0, %v4347_v63  ;;  %v3337_v40 = vmul.f32 %v4347_v63, %v4347_v63  ;;  %v3289_v30 = vadd.f32 %v3288_v19, %v3287_v1 }
 0x2b3   : > { %3233 = vst.msk [vmem:[%s5891_s3 + $0xd0] sm:$0xff] %vm1066_vm0, %v4349_v15  ;;  %v3290_v57 = vsel %vm1066_vm0, %v4349_v15, 0.0  ;;  %v3336_v0 = vmul.f32 %v4349_v15, %v4349_v15  ;;  %v2615_v3 = vadd.f32 %v5884_v6, %v2562_v39  ;;  %v3292_v36 = vsel %vm1066_vm0, %v4347_v63, 0.0 }
 0x2b4   : > { %v4351_v2 = vadd.f32 %v4278_v56, %v2616_v26  ;;  %v3291_v28 = vadd.f32 %v3290_v57, %v3289_v30  ;;  %v3392_v12 = vadd.f32 %v3391_v31, %v3390_v44  ;;  %v3395_v51 = vsel %vm1066_vm0, %v3337_v40, 0.0 }
 0x2b5   : > { %v4173_v52 = vpop.f32.mrb[62].mxu0  ;;  %v3393_v38 = vsel %vm1066_vm0, %v3336_v0, 0.0  ;;  %v4353_v60 = vadd.f32 %v3156_v45, %v2615_v3 }
 0x2b6   : > { %3236 = vst.msk [vmem:[%s5891_s3 + $0xe8] sm:$0xff] %vm1066_vm0, %v4351_v2  ;;  %v2572_v25 = vpop.f32.mrb[63].mxu0  ;;  %v3394_v24 = vadd.f32 %v3393_v38, %v3392_v12  ;;  %v3293_v54 = vadd.f32 %v3292_v36, %v3291_v28  ;;  %v2618_v47 = vadd.f32 %v4173_v52, %v5884_v6  ;;  %v3339_v61 = vmul.f32 %v4351_v2, %v4351_v2 }
 0x2b7   : > { %v2617_v43 = vadd.f32 %v5884_v6, %v2572_v25  ;;  %3235 = vst.msk [vmem:[%s5891_s3 + $0xe0] sm:$0xff] %vm1066_vm0, %v4353_v60  ;;  %v3294_v34 = vsel %vm1066_vm0, %v4353_v60, 0.0  ;;  %v3338_v29 = vmul.f32 %v4353_v60, %v4353_v60  ;;  %v3296_v10 = vsel %vm1066_vm0, %v4351_v2, 0.0 }
 0x2b8   : > { %v3295_v42 = vadd.f32 %v3294_v34, %v3293_v54  ;;  %v3396_v5 = vadd.f32 %v3395_v51, %v3394_v24  ;;  %v3399_v6 = vsel %vm1066_vm0, %v3339_v61, 0.0 }
 0x2b9   : > { %v3397_v53 = vsel %vm1066_vm0, %v3338_v29, 0.0 }
 0x2ba   : > { %v3398_v55 = vadd.f32 %v3397_v53, %v3396_v5  ;;  %v3297_v58 = vadd.f32 %v3296_v10, %v3295_v42 }
 0x2bc   : > { %v3400_v46 = vadd.f32 %v3399_v6, %v3398_v55 }
 0x2df   : > { %v4281_v33 = vpop.f32.mrb[30].mxu1 }
 0x2e0   : > { %v4355_v62 = vadd.f32 %v4281_v33, %v2618_v47  ;;  %v3166_v14 = vpop.f32.mrb[31].mxu1 }
 0x2e1   : > { %v4357_v21 = vadd.f32 %v3166_v14, %v2617_v43 }
 0x2e2   : > { %3238 = vst.msk [vmem:[%s5891_s3 + $0xf8] sm:$0xff] %vm1066_vm0, %v4355_v62  ;;  %v3341_v27 = vmul.f32 %v4355_v62, %v4355_v62  ;;  %v3300_v16 = vsel %vm1066_vm0, %v4355_v62, 0.0 }
 0x2e3   : > { %3237 = vst.msk [vmem:[%s5891_s3 + $0xf0] sm:$0xff] %vm1066_vm0, %v4357_v21  ;;  %v3298_v18 = vsel %vm1066_vm0, %v4357_v21, 0.0  ;;  %v3340_v37 = vmul.f32 %v4357_v21, %v4357_v21  ;;  %s6063_s3 = scalar_lea.hbm %s6158_s14, %s3916_s10 }
 0x2e4   : > { %v3299_v22 = vadd.f32 %v3298_v18, %v3297_v58  ;;  %v3403_v23 = vsel %vm1066_vm0, %v3341_v27, 0.0 }
 0x2e5   : > { %v3401_v4 = vsel %vm1066_vm0, %v3340_v37, 0.0 }
 0x2e6   : > { %v3301_v9 = vadd.f32 %v3300_v16, %v3299_v22  ;;  %v3402_v8 = vadd.f32 %v3401_v4, %v3400_v46 }
 0x2e8   : > { %v3302_v7 = vrot.slane %v3301_v9, 4  ;;  %v3404_v32 = vadd.f32 %v3403_v23, %v3402_v8 }
 0x2ea   : > { %v3303_v59 = vadd.f32 %v3302_v7, %v3301_v9  ;;  %v3405_v41 = vrot.slane %v3404_v32, 4 }
 0x2ec   : > { %v3304_v17 = vrot.slane %v3303_v59, 2  ;;  %v3406_v13 = vadd.f32 %v3405_v41, %v3404_v32 }
 0x2ee   : > { %v3305_v48 = vadd.f32 %v3304_v17, %v3303_v59  ;;  %v3407_v20 = vrot.slane %v3406_v13, 2 }
 0x2f0   : > { %v3306_v11 = vrot.slane %v3305_v48, 1  ;;  %v3408_v56 = vadd.f32 %v3407_v20, %v3406_v13 }
 0x2f2   : > { %v3307_v1 = vadd.f32 %v3306_v11, %v3305_v48  ;;  %v3409_v49 = vrot.slane %v3408_v56, 1 }
 0x2f4   : > { %3309 = vst.msk [vmem:[%s755_s27] sm:$0x1] %vm3308_vm7, %v3307_v1  ;;  %v3410_v63 = vadd.f32 %v3409_v49, %v3408_v56 }
 0x2f5   : > { %4468 = shalt.err (!%p4465_p5)
}
 0x2f6   : > { %s4469_s0 = scalar_lea.hbm %s6063_s3, 16  ;;  %s4473_s21 = scalar_lea.hbm %s6158_s14, 32 }
 0x2f7   : > { %p4470_p6 = scmp.ne.s32.totalorder %s6063_s3, %s4469_s0  ;;  %p4474_p10 = scmp.lt.u32.totalorder %s6063_s3, %s6158_s14 }
 0x2f8   : > { %p4475_p11 = scmp.lt.u32.totalorder %s4473_s21, %s4469_s0  ;;  %p4477_p13 = scmp.lt.u32.totalorder %s4469_s0, %s6063_s3 }
 0x2f9   : > { %p4471_p7 = pnand %p4470_p6, %p4692_p4 }
 0x2fa   : > { %p4476_p12 = por %p4475_p11, %p4474_p10 }
 0x2fb   : > { %p4472_p9 = pneg %p4471_p7 }
 0x2fc   : > { %p4478_p0 = por %p4477_p13, %p4476_p12 }
 0x2fe   : > { %p4479_p1 = pnand %p4478_p0, %p4472_p9 }
 0x300   : > { %4482 = shalt.err (!%p4479_p1)
}
 0x301   : > { %4390 = dma.vmem_to_hbm [thread:$0]  (%p4692_p4), %s6065_s22, 16, %s6063_s3, %s3433_s17  }
 0x302   : > { %s6190_s4 = scalar_lea.vmem [#allocation4], %s6053_s29  ;;  %s3437_s26 = scalar_lea.sflag [#allocation5], %s6053_s29 }
 0x303   : > { %3411 = vst.msk [vmem:[%s6190_s4] sm:$0x1] %vm3308_vm7, %v3410_v63  ;;  %s4483_s10 = scalar_lea.vmem %s6073_s24, 16  ;;  %s4571_s0 = smov [#allocation4]  }
 0x304   : > { %p4484_p2 = scmp.ne.s32.totalorder %s6073_s24, %s4483_s10  ;;  %s4487_s27 = sshll.u32 %s4571_s0, 4  ;;  %s4488_s27 = int_to_ptr.vmem [resolvable:$false] %s4487_s27 }
 0x305   : > { %s4489_s21 = scalar_lea.vmem %s4488_s27, 32  ;;  %p4490_p6 = scmp.lt.s32.totalorder %s6073_s24, %s4488_s27 }
 0x306   : > { %p4485_p3 = pnand %p4484_p2, %p4692_p4  ;;  %p4491_p7 = scmp.lt.s32.totalorder %s4489_s21, %s4483_s10 }
 0x308   : > { %p4486_p5 = pneg %p4485_p3  ;;  %p4492_p9 = por %p4491_p7, %p4490_p6 }
 0x30a   : > { %p4493_p10 = pnand %p4492_p9, %p4486_p5 }
 0x30c   : > { %4496 = shalt.err (!%p4493_p10)
}
 0x30d   : > { %s4497_s29 = scalar_lea.hbm %s6071_s1, 16  ;;  %s4501_s3 = scalar_lea.hbm %s6159_s15, 32 }
 0x30e   : > { %p4498_p11 = scmp.ne.s32.totalorder %s6071_s1, %s4497_s29  ;;  %p4502_p0 = scmp.lt.u32.totalorder %s6071_s1, %s6159_s15 }
 0x30f   : > { %p4503_p1 = scmp.lt.u32.totalorder %s4501_s3, %s4497_s29  ;;  %p4505_p3 = scmp.lt.u32.totalorder %s4497_s29, %s6071_s1 }
 0x310   : > { %p4499_p12 = pnand %p4498_p11, %p4692_p4 }
 0x311   : > { %p4504_p2 = por %p4503_p1, %p4502_p0 }
 0x312   : > { %p4500_p13 = pneg %p4499_p12 }
 0x313   : > { %p4506_p5 = por %p4505_p3, %p4504_p2 }
 0x315   : > { %p4507_p6 = pnand %p4506_p5, %p4500_p13 }
 0x317   : > { %4510 = shalt.err (!%p4507_p6)
}
 0x318   : > { %4391 = dma.vmem_to_hbm [thread:$0]  (%p4692_p4), %s6073_s24, 16, %s6071_s1, %s3437_s26  }
 0x319 PF: > { %p4401_p7 = scmp.ge.s32.totalorder %s4565_s23, 2  ;;  %s3510_s4 = sand.u32 1, %s4545_s18  }
 0x31a   : > { %s3511_s10 = scalar_lea.sflag [#allocation3], %s3510_s4 }
 0x31b   : > { %p4395_p9 = pnand %p4401_p7, %p4699_p8 }
 0x31d   : > { %4536 = dma.done.wait (!%p4395_p9), %s3511_s10, 16  }
 0x31e   : > { %4538 = vsyncadd (!%p4395_p9), %s3511_s10, 4294967280  ;;  %s3519_s0 = scalar_lea.sflag [#allocation5], %s3510_s4 }
 0x31f   : > { %4540 = dma.done.wait (!%p4395_p9), %s3519_s0, 16  }
 0x320   : > { %4542 = vsyncadd (!%p4395_p9), %s3519_s0, 4294967280  ;;  %s32_s23 = sadd.s32 1, %s4565_s23   ;;  %s6191_s21 = sld [smem:[#allocation8_spill]] }
 0x321   : > { %p29_p10 = scmp.ge.s32.totalorder %s32_s23, 4   ;;  %s6192_s22 = sld [smem:[#allocation9_spill]] }
 0x322   : > { %s6193_s18 = smov %s4549_s19  ;;  %s6194_s19 = smov %s4553_s20 }
 0x323   : > { %s6195_s20 = smov %s4705_s16  ;;  %31 = sbr.rel (!%p29_p10) target bundleno = 13 (0xd), region = 159 }
 0x32a   :  { %3523 = vsyncpa [#allocation3], 1 }
 0x32b   :  { %3525 = vsyncpa [#allocation3 + $0x1], 1 }
 0x32c   :  { %3526 = vsyncpa [#allocation5], 1 }
 0x32d   :  { %3528 = vsyncpa [#allocation5 + $0x1], 1 }

</bundles_post_ra>
